<compile_context>
chip_gen: v5e
topology: v5e:2x2
jax: 0.10.0
libtpu: 0.0.40
codegen_flags: <defaults>
</compile_context>

<pallas_src>
import jax
import jax.numpy as jnp
from jax.experimental import pallas as pl
from jax.experimental.pallas import tpu as pltpu

INPUT_SIZE = 100
H1, H2, H3 = 128, 256, 512
OUTPUT_SIZE = 784

IN_PAD = 128  # 100 -> 128 lane-padded input width (zero weight rows absorb it)


def _round_up(n, m):
    return (n + m - 1) // m * m


def generator_kernel(x_ref,
                     w1_ref, b1_ref,
                     w2_ref, b2_ref,
                     w3_ref, b3_ref,
                     w4_ref, b4_ref,
                     o_ref):
    # x/weights are bf16 (MXU-native), accumulation + bias + nonlinearity in
    # f32, activations carried bf16 between layers.
    h = x_ref[...]  # (tm, 128) bf16
    for w_ref, b_ref in ((w1_ref, b1_ref), (w2_ref, b2_ref), (w3_ref, b3_ref)):
        a = jnp.dot(h, w_ref[...], preferred_element_type=jnp.float32) + b_ref[...]
        h = jnp.maximum(a, 0.0).astype(jnp.bfloat16)
    a = jnp.dot(h, w4_ref[...], preferred_element_type=jnp.float32) + b4_ref[...]
    o_ref[...] = jnp.tanh(a).astype(o_ref.dtype)


def prepare_params(params):
    """Zero-pad W1 rows 100->128, cast weights to bf16; biases stay f32."""
    (w1, b1), (w2, b2), (w3, b3), (w4, b4) = params
    w1p = jnp.zeros((IN_PAD, H1), jnp.float32).at[:INPUT_SIZE, :].set(w1)
    return (w1p.astype(jnp.bfloat16), b1,
            w2.astype(jnp.bfloat16), b2,
            w3.astype(jnp.bfloat16), b3,
            w4.astype(jnp.bfloat16), b4)


def _pick_tm(B):
    b8 = _round_up(B, 8)
    target = 512  # big tiles amortize the ~0.35 us per-step overhead
    if b8 <= 8:
        return 8
    if b8 <= 2 * target:
        # >= 2 grid steps so the "parallel" batch axis shards across both
        # TensorCores on v7x (no-op on single-TC v5e/v6e).
        return _round_up(pl.cdiv(b8, 2), 8)
    return target


def generator_forward(x, params, *, tm=None):
    """x: (B, 100) f32 -> (B, 784) bf16 (tanh output, |err| ~ 2^-9)."""
    w1, b1, w2, b2, w3, b3, w4, b4 = prepare_params(params)
    B = x.shape[0]

    if tm is None:
        tm = _pick_tm(B)

    # Pre-cast to bf16 and lane-pad 100 -> 128 (extra K cols hit zero W1 rows).
    x_p = jnp.pad(x.astype(jnp.bfloat16), ((0, 0), (0, IN_PAD - INPUT_SIZE)))

    grid = (pl.cdiv(B, tm),)  # ragged last tile: OOB reads ignored, writes masked

    # Weights/biases: constant index_map -> DMA'd once, resident across the
    # whole batch loop.  x/out tiles are double-buffered by the pipeline.
    resident = lambda shape: pl.BlockSpec(shape, lambda i: (0, 0))

    flops = 2 * B * (IN_PAD * H1 + H1 * H2 + H2 * H3 + H3 * OUTPUT_SIZE)
    weight_bytes = 2 * (IN_PAD * H1 + H1 * H2 + H2 * H3 + H3 * OUTPUT_SIZE)  # bf16
    bias_bytes = 4 * (H1 + H2 + H3 + OUTPUT_SIZE)
    io_bytes = 2 * B * (IN_PAD + OUTPUT_SIZE)  # bf16 in + bf16 out
    cost = pl.CostEstimate(flops=flops,
                           transcendentals=B * OUTPUT_SIZE,
                           bytes_accessed=weight_bytes + bias_bytes + io_bytes)

    out = pl.pallas_call(
        generator_kernel,
        out_shape=jax.ShapeDtypeStruct((B, OUTPUT_SIZE), jnp.bfloat16),
        grid=grid,
        in_specs=[
            pl.BlockSpec((tm, IN_PAD), lambda i: (i, 0)),
            resident((IN_PAD, H1)), resident((1, H1)),
            resident((H1, H2)),     resident((1, H2)),
            resident((H2, H3)),     resident((1, H3)),
            resident((H3, OUTPUT_SIZE)), resident((1, OUTPUT_SIZE)),
        ],
        out_specs=pl.BlockSpec((tm, OUTPUT_SIZE), lambda i: (i, 0)),
        compiler_params=pltpu.CompilerParams(
            dimension_semantics=("parallel",),
            vmem_limit_bytes=32 * 1024 * 1024),
        cost_estimate=cost,
    )(x_p, w1, b1, w2, b2, w3, b3, w4, b4)

    return out  # (B, 784) bf16 — no post-call slice/copy


def init_params(key):
    """Deterministic init mimicking torch.nn.Linear U[-1/sqrt(fan_in), 1/sqrt(fan_in)]."""
    dims = [(INPUT_SIZE, H1), (H1, H2), (H2, H3), (H3, OUTPUT_SIZE)]
    params = []
    for (fan_in, fan_out) in dims:
        key, kw, kb = jax.random.split(key, 3)
        bound = 1.0 / jnp.sqrt(fan_in)
        w = jax.random.uniform(kw, (fan_in, fan_out), jnp.float32, -bound, bound)
        b = jax.random.uniform(kb, (1, fan_out), jnp.float32, -bound, bound)
        params.append((w, b))
    return params


def reference_forward(x, params):
    """Pure-JAX reference emulating the kernel's bf16-weight/activation math."""
    h = x.astype(jnp.bfloat16).astype(jnp.float32)
    for i, (w, b) in enumerate(params):
        wq = w.astype(jnp.bfloat16).astype(jnp.float32)
        h = jnp.dot(h, wq, precision=jax.lax.Precision.HIGHEST) + b
        if i < 3:
            h = jnp.maximum(h, 0.0).astype(jnp.bfloat16).astype(jnp.float32)
        else:
            h = jnp.tanh(h)
    return h


if __name__ == "__main__":
    key = jax.random.PRNGKey(0)
    key, kx = jax.random.split(key)

    B = 8  # small batch, multiple of 8 sublanes
    x = jax.random.normal(kx, (B, INPUT_SIZE), jnp.float32)

    params = init_params(key)

    out = generator_forward(x, params)
    out = jax.block_until_ready(out)

    ref = reference_forward(x, params)
    assert out.shape == (B, OUTPUT_SIZE)
    # bf16 weights/activations + bf16 output quantization (~2^-9 abs for tanh).
    assert jnp.allclose(out.astype(jnp.float32), ref, atol=2e-2, rtol=2e-2), \
        "mismatch vs reference"

    print("KERNEL_OK")
</pallas_src>

<mosaic_0001>
module attributes {stable_mosaic.version = 11 : i64} {
  func.func @generator_kernel(%arg0: i32, %arg1: memref<8x128xbf16, #tpu.memory_space<vmem>>, %arg2: memref<128x128xbf16, #tpu.memory_space<vmem>>, %arg3: memref<1x128xf32, #tpu.memory_space<vmem>>, %arg4: memref<128x256xbf16, #tpu.memory_space<vmem>>, %arg5: memref<1x256xf32, #tpu.memory_space<vmem>>, %arg6: memref<256x512xbf16, #tpu.memory_space<vmem>>, %arg7: memref<1x512xf32, #tpu.memory_space<vmem>>, %arg8: memref<512x784xbf16, #tpu.memory_space<vmem>>, %arg9: memref<1x784xf32, #tpu.memory_space<vmem>>, %arg10: memref<8x784xbf16, #tpu.memory_space<vmem>>) attributes {dimension_semantics = [#tpu.dimension_semantics<parallel>], iteration_bounds = array<i64: 1>, scalar_prefetch = 0 : i64, scratch_operands = 0 : i64, tpu.core_type = #tpu.core_type<tc>, window_params = [{transform_indices = @transform_0, window_bounds = array<i64: 8, 128>}, {pipeline_mode = #tpu.pipeline_mode<synchronous>, transform_indices = @transform_1, window_bounds = array<i64: 128, 128>}, {pipeline_mode = #tpu.pipeline_mode<synchronous>, transform_indices = @transform_2, window_bounds = array<i64: 1, 128>}, {pipeline_mode = #tpu.pipeline_mode<synchronous>, transform_indices = @transform_3, window_bounds = array<i64: 128, 256>}, {pipeline_mode = #tpu.pipeline_mode<synchronous>, transform_indices = @transform_4, window_bounds = array<i64: 1, 256>}, {pipeline_mode = #tpu.pipeline_mode<synchronous>, transform_indices = @transform_5, window_bounds = array<i64: 256, 512>}, {pipeline_mode = #tpu.pipeline_mode<synchronous>, transform_indices = @transform_6, window_bounds = array<i64: 1, 512>}, {pipeline_mode = #tpu.pipeline_mode<synchronous>, transform_indices = @transform_7, window_bounds = array<i64: 512, 784>}, {pipeline_mode = #tpu.pipeline_mode<synchronous>, transform_indices = @transform_8, window_bounds = array<i64: 1, 784>}, {transform_indices = @transform_9, window_bounds = array<i64: 8, 784>}]} {
    %c0 = arith.constant 0 : index
    %c0_0 = arith.constant 0 : index
    %0 = vector.load %arg1[%c0, %c0_0] : memref<8x128xbf16, #tpu.memory_space<vmem>>, vector<8x128xbf16>
    %c0_1 = arith.constant 0 : index
    %c0_2 = arith.constant 0 : index
    %1 = vector.load %arg2[%c0_1, %c0_2] : memref<128x128xbf16, #tpu.memory_space<vmem>>, vector<128x128xbf16>
    %cst = arith.constant dense<0.000000e+00> : vector<8x128xf32>
    %2 = tpu.matmul %0, %1, %cst {dimension_numbers = #tpu.dot_dimension_numbers<[1], [0], [0], [1], [0, 0, 1, 1], [], []>} : vector<8x128xbf16>, vector<128x128xbf16>, vector<8x128xf32> -> vector<8x128xf32>
    %c0_3 = arith.constant 0 : index
    %c0_4 = arith.constant 0 : index
    %3 = vector.load %arg3[%c0_3, %c0_4] : memref<1x128xf32, #tpu.memory_space<vmem>>, vector<1x128xf32>
    %4 = vector.broadcast %3 : vector<1x128xf32> to vector<8x128xf32>
    %5 = arith.addf %2, %4 : vector<8x128xf32>
    %cst_5 = arith.constant 0.000000e+00 : f32
    %6 = vector.broadcast %cst_5 : f32 to vector<8x128xf32>
    %7 = arith.maximumf %5, %6 : vector<8x128xf32>
    %8 = arith.truncf %7 : vector<8x128xf32> to vector<8x128xbf16>
    %c0_6 = arith.constant 0 : index
    %c0_7 = arith.constant 0 : index
    %9 = vector.load %arg4[%c0_6, %c0_7] : memref<128x256xbf16, #tpu.memory_space<vmem>>, vector<128x256xbf16>
    %cst_8 = arith.constant dense<0.000000e+00> : vector<8x256xf32>
    %10 = tpu.matmul %8, %9, %cst_8 {dimension_numbers = #tpu.dot_dimension_numbers<[1], [0], [0], [1], [0, 0, 1, 1], [], []>} : vector<8x128xbf16>, vector<128x256xbf16>, vector<8x256xf32> -> vector<8x256xf32>
    %c0_9 = arith.constant 0 : index
    %c0_10 = arith.constant 0 : index
    %11 = vector.load %arg5[%c0_9, %c0_10] : memref<1x256xf32, #tpu.memory_space<vmem>>, vector<1x256xf32>
    %12 = vector.broadcast %11 : vector<1x256xf32> to vector<8x256xf32>
    %13 = arith.addf %10, %12 : vector<8x256xf32>
    %cst_11 = arith.constant 0.000000e+00 : f32
    %14 = vector.broadcast %cst_11 : f32 to vector<8x256xf32>
    %15 = arith.maximumf %13, %14 : vector<8x256xf32>
    %16 = arith.truncf %15 : vector<8x256xf32> to vector<8x256xbf16>
    %c0_12 = arith.constant 0 : index
    %c0_13 = arith.constant 0 : index
    %17 = vector.load %arg6[%c0_12, %c0_13] : memref<256x512xbf16, #tpu.memory_space<vmem>>, vector<256x512xbf16>
    %cst_14 = arith.constant dense<0.000000e+00> : vector<8x512xf32>
    %18 = tpu.matmul %16, %17, %cst_14 {dimension_numbers = #tpu.dot_dimension_numbers<[1], [0], [0], [1], [0, 0, 1, 1], [], []>} : vector<8x256xbf16>, vector<256x512xbf16>, vector<8x512xf32> -> vector<8x512xf32>
    %c0_15 = arith.constant 0 : index
    %c0_16 = arith.constant 0 : index
    %19 = vector.load %arg7[%c0_15, %c0_16] : memref<1x512xf32, #tpu.memory_space<vmem>>, vector<1x512xf32>
    %20 = vector.broadcast %19 : vector<1x512xf32> to vector<8x512xf32>
    %21 = arith.addf %18, %20 : vector<8x512xf32>
    %cst_17 = arith.constant 0.000000e+00 : f32
    %22 = vector.broadcast %cst_17 : f32 to vector<8x512xf32>
    %23 = arith.maximumf %21, %22 : vector<8x512xf32>
    %24 = arith.truncf %23 : vector<8x512xf32> to vector<8x512xbf16>
    %c0_18 = arith.constant 0 : index
    %c0_19 = arith.constant 0 : index
    %25 = vector.load %arg8[%c0_18, %c0_19] : memref<512x784xbf16, #tpu.memory_space<vmem>>, vector<512x784xbf16>
    %cst_20 = arith.constant dense<0.000000e+00> : vector<8x784xf32>
    %26 = tpu.matmul %24, %25, %cst_20 {dimension_numbers = #tpu.dot_dimension_numbers<[1], [0], [0], [1], [0, 0, 1, 1], [], []>} : vector<8x512xbf16>, vector<512x784xbf16>, vector<8x784xf32> -> vector<8x784xf32>
    %c0_21 = arith.constant 0 : index
    %c0_22 = arith.constant 0 : index
    %27 = vector.load %arg9[%c0_21, %c0_22] : memref<1x784xf32, #tpu.memory_space<vmem>>, vector<1x784xf32>
    %28 = vector.broadcast %27 : vector<1x784xf32> to vector<8x784xf32>
    %29 = arith.addf %26, %28 : vector<8x784xf32>
    %30 = math.tanh %29 : vector<8x784xf32>
    %31 = arith.truncf %30 : vector<8x784xf32> to vector<8x784xbf16>
    %c0_23 = arith.constant 0 : index
    %c0_24 = arith.constant 0 : index
    %32 = vector.load %arg10[%c0_23, %c0_24] : memref<8x784xbf16, #tpu.memory_space<vmem>>, vector<8x784xbf16>
    tpu.vector_store %arg10[%c0_23, %c0_24], %31 {strides = array<i32>} : memref<8x784xbf16, #tpu.memory_space<vmem>>, vector<8x784xbf16>,
    return
  }
  func.func @transform_0(%arg0: i32) -> (i32, i32) {
    %c0_i32 = arith.constant 0 : i32
    %c0_i32_0 = arith.constant 0 : i32
    return %arg0, %c0_i32 : i32, i32
  }
  func.func @transform_1(%arg0: i32) -> (i32, i32) {
    %c0_i32 = arith.constant 0 : i32
    %c0_i32_0 = arith.constant 0 : i32
    %c0_i32_1 = arith.constant 0 : i32
    return %c0_i32, %c0_i32_0 : i32, i32
  }
  func.func @transform_2(%arg0: i32) -> (i32, i32) {
    %c0_i32 = arith.constant 0 : i32
    %c0_i32_0 = arith.constant 0 : i32
    %c0_i32_1 = arith.constant 0 : i32
    return %c0_i32, %c0_i32_0 : i32, i32
  }
  func.func @transform_3(%arg0: i32) -> (i32, i32) {
    %c0_i32 = arith.constant 0 : i32
    %c0_i32_0 = arith.constant 0 : i32
    %c0_i32_1 = arith.constant 0 : i32
    return %c0_i32, %c0_i32_0 : i32, i32
  }
  func.func @transform_4(%arg0: i32) -> (i32, i32) {
    %c0_i32 = arith.constant 0 : i32
    %c0_i32_0 = arith.constant 0 : i32
    %c0_i32_1 = arith.constant 0 : i32
    return %c0_i32, %c0_i32_0 : i32, i32
  }
  func.func @transform_5(%arg0: i32) -> (i32, i32) {
    %c0_i32 = arith.constant 0 : i32
    %c0_i32_0 = arith.constant 0 : i32
    %c0_i32_1 = arith.constant 0 : i32
    return %c0_i32, %c0_i32_0 : i32, i32
  }
  func.func @transform_6(%arg0: i32) -> (i32, i32) {
    %c0_i32 = arith.constant 0 : i32
    %c0_i32_0 = arith.constant 0 : i32
    %c0_i32_1 = arith.constant 0 : i32
    return %c0_i32, %c0_i32_0 : i32, i32
  }
  func.func @transform_7(%arg0: i32) -> (i32, i32) {
    %c0_i32 = arith.constant 0 : i32
    %c0_i32_0 = arith.constant 0 : i32
    %c0_i32_1 = arith.constant 0 : i32
    return %c0_i32, %c0_i32_0 : i32, i32
  }
  func.func @transform_8(%arg0: i32) -> (i32, i32) {
    %c0_i32 = arith.constant 0 : i32
    %c0_i32_0 = arith.constant 0 : i32
    %c0_i32_1 = arith.constant 0 : i32
    return %c0_i32, %c0_i32_0 : i32, i32
  }
  func.func @transform_9(%arg0: i32) -> (i32, i32) {
    %c0_i32 = arith.constant 0 : i32
    %c0_i32_0 = arith.constant 0 : i32
    return %arg0, %c0_i32 : i32, i32
  }
}

</mosaic_0001>

<bundles_post_ra>
// kernel: tpu_custom_call.1
= control target key start
LH: loop header
LB: loop body
LE: loop exit
PB: predicated region body
PF: predicated region fallthrough
CT: control target
= control target key end

     0   :  { %s6169_s0 = inlined_call_operand.vmem [shape: bf16[8,128], index: 0, kind: input, shape index: {}]   ;;  %s6170_s1 = inlined_call_operand.vmem [shape: bf16[128,128], index: 1, kind: input, shape index: {}]   ;;  %s6171_s2 = inlined_call_operand.vmem [shape: f32[1,128], index: 2, kind: input, shape index: {}]   ;;  %s6172_s3 = inlined_call_operand.vmem [shape: bf16[128,256], index: 3, kind: input, shape index: {}]   ;;  %s6173_s4 = inlined_call_operand.vmem [shape: f32[1,256], index: 4, kind: input, shape index: {}]   ;;  %s6174_s5 = inlined_call_operand.vmem [shape: bf16[256,512], index: 5, kind: input, shape index: {}]   ;;  %s6175_s6 = inlined_call_operand.vmem [shape: f32[1,512], index: 6, kind: input, shape index: {}]   ;;  %s6176_s7 = inlined_call_operand.vmem [shape: bf16[512,784], index: 7, kind: input, shape index: {}]   ;;  %s6177_s8 = inlined_call_operand.vmem [shape: f32[1,784], index: 8, kind: input, shape index: {}]   ;;  %s6178_s9 = inlined_call_operand.hbm [shape: bf16[8,784], index: 9, kind: output, shape index: {}]  }
   0x1   :  { %v3830_v0 = vld [vmem:[%s6170_s1 + $0x38] sm:$0xff]  ;;  %v3829_v1 = vld [vmem:[%s6170_s1 + $0x30] sm:$0xff]  ;;  %v2657_v7 = vld [vmem:[%s6172_s3 + $0x60] sm:$0xf] }
   0x2   :  { %102 = vmatpush.bf16.msra.mxu0 %v3830_v0  ;;  %v2665_v2 = vld [vmem:[%s6172_s3 + $0x70] sm:$0xf]  ;;  %v3846_v3 = vld [vmem:[%s6172_s3 + $0x74] sm:$0xf0]  ;;  %v3845_v4 = vld [vmem:[%s6172_s3 + $0x74] sm:$0xf] }
   0x3   :  { %v2666_v5 = vor.u32 %v3846_v3, %v2665_v2  ;;  %v2667_v6 = vld [vmem:[%s6172_s3 + $0x78] sm:$0xf0]  ;;  %v3844_v8 = vld [vmem:[%s6172_s3 + $0x64] sm:$0xf0]  ;;  %v3843_v10 = vld [vmem:[%s6172_s3 + $0x64] sm:$0xf] }
   0x4   :  { %v2670_v9 = vor.u32 %v3845_v4, %v2667_v6  ;;  %v2659_v11 = vld [vmem:[%s6172_s3 + $0x68] sm:$0xf0]  ;;  %v2658_v13 = vor.u32 %v3844_v8, %v2657_v7  ;;  %v2649_v15 = vld [vmem:[%s6172_s3 + $0x50] sm:$0xf]  ;;  %v3842_v16 = vld [vmem:[%s6172_s3 + $0x54] sm:$0xf0] }
   0x5   :  { %v3828_v12 = vld [vmem:[%s6170_s1 + $0x28] sm:$0xff]  ;;  %219 = vmatpush.bf16.msra.mxu1 %v2666_v5  ;;  %v2662_v14 = vor.u32 %v3843_v10, %v2659_v11  ;;  %v3841_v17 = vld [vmem:[%s6172_s3 + $0x54] sm:$0xf]  ;;  %v2651_v18 = vld [vmem:[%s6172_s3 + $0x58] sm:$0xf0]  ;;  %v2650_v20 = vor.u32 %v3842_v16, %v2649_v15 }
   0x6   :  { %103 = vmatpush.bf16.msra.mxu0 %v3829_v1  ;;  %232 = vmatpush.bf16.msra.mxu2 %v2670_v9  ;;  %v3827_v19 = vld [vmem:[%s6170_s1 + $0x20] sm:$0xff]  ;;  %v2654_v22 = vor.u32 %v3841_v17, %v2651_v18  ;;  %v3840_v23 = vld [vmem:[%s6172_s3 + $0x44] sm:$0xf0] }
   0x7   :  { %v2641_v21 = vld [vmem:[%s6172_s3 + $0x40] sm:$0xf] }
   0x9   :  { %220 = vmatpush.bf16.msra.mxu1 %v2658_v13 }
   0xa   :  { %104 = vmatpush.bf16.msra.mxu0 %v3828_v12  ;;  %233 = vmatpush.bf16.msra.mxu2 %v2662_v14 }
   0xb   :  { %14 = vsyncpa [#allocation3], 0  ;;  %v3839_v24 = vld [vmem:[%s6172_s3 + $0x44] sm:$0xf]  ;;  %v2643_v25 = vld [vmem:[%s6172_s3 + $0x48] sm:$0xf0]  ;;  %v2642_v27 = vor.u32 %v3840_v23, %v2641_v21 }
   0xc   :  { %v3826_v26 = vld [vmem:[%s6170_s1 + $0x18] sm:$0xff]  ;;  %v2646_v28 = vor.u32 %v3839_v24, %v2643_v25  ;;  %v2633_v29 = vld [vmem:[%s6172_s3 + $0x30] sm:$0xf]  ;;  %v3837_v31 = vld [vmem:[%s6172_s3 + $0x34] sm:$0xf]  ;;  %s2566_s28 = sshll.u32 %s6178_s9, 4  ;;  %s2567_s28 = int_to_ptr.hbm [resolvable:$true] %s2566_s28 }
   0xd   :  { %221 = vmatpush.bf16.msra.mxu1 %v2650_v20  ;;  %v3838_v30 = vld [vmem:[%s6172_s3 + $0x34] sm:$0xf0]  ;;  %v2635_v32 = vld [vmem:[%s6172_s3 + $0x38] sm:$0xf0]  ;;  %v3825_v33 = vld [vmem:[%s6170_s1 + $0x10] sm:$0xff]  ;;  %vm2557_vm0 = vcmask 125952  }
   0xe   :  { %105 = vmatpush.bf16.msra.mxu0 %v3827_v19  ;;  %234 = vmatpush.bf16.msra.mxu2 %v2654_v22  ;;  %v2634_v34 = vor.u32 %v3838_v30, %v2633_v29  ;;  %v2638_v35 = vor.u32 %v3837_v31, %v2635_v32  ;;  %v2625_v36 = vld [vmem:[%s6172_s3 + $0x20] sm:$0xf]  ;;  %v3836_v37 = vld [vmem:[%s6172_s3 + $0x24] sm:$0xf0]  ;;  %v3835_v38 = vld [vmem:[%s6172_s3 + $0x24] sm:$0xf] }
   0xf   :  { %v2627_v39 = vld [vmem:[%s6172_s3 + $0x28] sm:$0xf0]  ;;  %v2626_v41 = vor.u32 %v3836_v37, %v2625_v36  ;;  %v3823_v43 = vld [vmem:[%s6170_s1] sm:$0xff]  ;;  %v2617_v45 = vld [vmem:[%s6172_s3 + $0x10] sm:$0xf] }
  0x10   :  { %v3824_v40 = vld [vmem:[%s6170_s1 + $0x8] sm:$0xff]  ;;  %v2630_v42 = vor.u32 %v3835_v38, %v2627_v39  ;;  %v33_v44 = vld [vmem:[%s6169_s0] sm:$0xf]  ;;  %v3834_v46 = vld [vmem:[%s6172_s3 + $0x14] sm:$0xf0] }
  0x11   :  { %222 = vmatpush.bf16.msra.mxu1 %v2642_v27  ;;  %v3833_v47 = vld [vmem:[%s6172_s3 + $0x14] sm:$0xf]  ;;  %v2618_v48 = vor.u32 %v3834_v46, %v2617_v45  ;;  %v2619_v49 = vld [vmem:[%s6172_s3 + $0x18] sm:$0xf0]  ;;  %v2609_v51 = vld [vmem:[%s6172_s3] sm:$0xf] }
  0x12   :  { %106 = vmatpush.bf16.msra.mxu0 %v3826_v26  ;;  %235 = vmatpush.bf16.msra.mxu2 %v2646_v28  ;;  %v2622_v50 = vor.u32 %v3833_v47, %v2619_v49  ;;  %v3832_v52 = vld [vmem:[%s6172_s3 + $0x4] sm:$0xf0]  ;;  %v3831_v53 = vld [vmem:[%s6172_s3 + $0x4] sm:$0xf]  ;;  %v2611_v55 = vld [vmem:[%s6172_s3 + $0x8] sm:$0xf0] }
  0x13   :  { %v2610_v54 = vor.u32 %v3832_v52, %v2609_v51  ;;  %v2614_v56 = vor.u32 %v3831_v53, %v2611_v55  ;;  %v2785_v57 = vld [vmem:[%s6174_s5 + $0xe0] sm:$0xf]  ;;  %v3877_v58 = vld [vmem:[%s6174_s5 + $0xec] sm:$0xf0]  ;;  %v3875_v59 = vld [vmem:[%s6174_s5 + $0xe4] sm:$0xf] }
  0x14   :  { %v2786_v60 = vor.u32 %v3877_v58, %v2785_v57  ;;  %v2787_v61 = vld [vmem:[%s6174_s5 + $0xf0] sm:$0xf0]  ;;  %v2769_v62 = vld [vmem:[%s6174_s5 + $0xc0] sm:$0xf]  ;;  %v3873_v63 = vld [vmem:[%s6174_s5 + $0xcc] sm:$0xf0] }
  0x15   :  { %223 = vmatpush.bf16.msra.mxu1 %v2634_v34  ;;  %v2790_v0 = vor.u32 %v3875_v59, %v2787_v61  ;;  %v3871_v1 = vld [vmem:[%s6174_s5 + $0xc4] sm:$0xf]  ;;  %v2771_v2 = vld [vmem:[%s6174_s5 + $0xd0] sm:$0xf0]  ;;  %v2913_v3 = vld [vmem:[%s6174_s5 + $0x1e0] sm:$0xf]  ;;  %v2770_v4 = vor.u32 %v3873_v63, %v2769_v62 }
  0x16   :  { %107 = vmatpush.bf16.msra.mxu0 %v3825_v33  ;;  %236 = vmatpush.bf16.msra.mxu2 %v2638_v35  ;;  %v3909_v5 = vld [vmem:[%s6174_s5 + $0x1ec] sm:$0xf0]  ;;  %v3907_v6 = vld [vmem:[%s6174_s5 + $0x1e4] sm:$0xf]  ;;  %v2915_v7 = vld [vmem:[%s6174_s5 + $0x1f0] sm:$0xf0]  ;;  %v2774_v8 = vor.u32 %v3871_v1, %v2771_v2 }
  0x17   :  { %643 = vmatpush.bf16.msra.mxu3 %v2786_v60  ;;  %v2914_v9 = vor.u32 %v3909_v5, %v2913_v3  ;;  %v2918_v10 = vor.u32 %v3907_v6, %v2915_v7  ;;  %v2753_v11 = vld [vmem:[%s6174_s5 + $0xa0] sm:$0xf]  ;;  %v3869_v12 = vld [vmem:[%s6174_s5 + $0xac] sm:$0xf0]  ;;  %v3867_v13 = vld [vmem:[%s6174_s5 + $0xa4] sm:$0xf] }
  0x18   :  { %v2755_v14 = vld [vmem:[%s6174_s5 + $0xb0] sm:$0xf0]  ;;  %v2897_v15 = vld [vmem:[%s6174_s5 + $0x1c0] sm:$0xf]  ;;  %v3905_v16 = vld [vmem:[%s6174_s5 + $0x1cc] sm:$0xf0]  ;;  %v2754_v20 = vor.u32 %v3869_v12, %v2753_v11 }
  0x19   :  { %224 = vmatpush.bf16.msra.mxu1 %v2626_v41  ;;  %v2898_v17 = vor.u32 %v3905_v16, %v2897_v15  ;;  %v3903_v18 = vld [vmem:[%s6174_s5 + $0x1c4] sm:$0xf]  ;;  %v2899_v19 = vld [vmem:[%s6174_s5 + $0x1d0] sm:$0xf0]  ;;  %v2737_v22 = vld [vmem:[%s6174_s5 + $0x80] sm:$0xf]  ;;  %v2758_v24 = vor.u32 %v3867_v13, %v2755_v14 }
  0x1a   :  { %108 = vmatpush.bf16.msra.mxu0 %v3824_v40  ;;  %237 = vmatpush.bf16.msra.mxu2 %v2630_v42  ;;  %v2902_v21 = vor.u32 %v3903_v18, %v2899_v19  ;;  %v3865_v23 = vld [vmem:[%s6174_s5 + $0x8c] sm:$0xf0]  ;;  %v2881_v25 = vld [vmem:[%s6174_s5 + $0x1a0] sm:$0xf]  ;;  %v3899_v27 = vld [vmem:[%s6174_s5 + $0x1a4] sm:$0xf] }
  0x1b   :  { %644 = vmatpush.bf16.msra.mxu3 %v2770_v4  ;;  %v3901_v26 = vld [vmem:[%s6174_s5 + $0x1ac] sm:$0xf0]  ;;  %v3863_v28 = vld [vmem:[%s6174_s5 + $0x84] sm:$0xf]  ;;  %v2739_v29 = vld [vmem:[%s6174_s5 + $0x90] sm:$0xf0]  ;;  %v2738_v34 = vor.u32 %v3865_v23, %v2737_v22 }
  0x1c   :  { %v2883_v30 = vld [vmem:[%s6174_s5 + $0x1b0] sm:$0xf0]  ;;  %v2882_v31 = vor.u32 %v3901_v26, %v2881_v25  ;;  %v2865_v33 = vld [vmem:[%s6174_s5 + $0x180] sm:$0xf]  ;;  %v3897_v35 = vld [vmem:[%s6174_s5 + $0x18c] sm:$0xf0]  ;;  %v2742_v38 = vor.u32 %v3863_v28, %v2739_v29 }
  0x1d   :  { %225 = vmatpush.bf16.msra.mxu1 %v2618_v48  ;;  %v2886_v32 = vor.u32 %v3899_v27, %v2883_v30  ;;  %v3895_v36 = vld [vmem:[%s6174_s5 + $0x184] sm:$0xf]  ;;  %v2867_v37 = vld [vmem:[%s6174_s5 + $0x190] sm:$0xf0]  ;;  %v2721_v39 = vld [vmem:[%s6174_s5 + $0x60] sm:$0xf] }
  0x1e   :  { %109 = vmatpush.bf16.msra.mxu0 %v3823_v43  ;;  %238 = vmatpush.bf16.msra.mxu2 %v2622_v50  ;;  %v3861_v40 = vld [vmem:[%s6174_s5 + $0x6c] sm:$0xf0]  ;;  %v3859_v41 = vld [vmem:[%s6174_s5 + $0x64] sm:$0xf]  ;;  %v2723_v42 = vld [vmem:[%s6174_s5 + $0x70] sm:$0xf0]  ;;  %v2866_v43 = vor.u32 %v3897_v35, %v2865_v33 }
  0x1f   :  { %645 = vmatpush.bf16.msra.mxu3 %v2754_v20  ;;  %v2849_v45 = vld [vmem:[%s6174_s5 + $0x160] sm:$0xf]  ;;  %v2722_v46 = vor.u32 %v3861_v40, %v2721_v39  ;;  %v3893_v47 = vld [vmem:[%s6174_s5 + $0x16c] sm:$0xf0]  ;;  %v3891_v48 = vld [vmem:[%s6174_s5 + $0x164] sm:$0xf]  ;;  %v2726_v50 = vor.u32 %v3859_v41, %v2723_v42 }
  0x20   :  { %v2851_v49 = vld [vmem:[%s6174_s5 + $0x170] sm:$0xf0]  ;;  %v2705_v51 = vld [vmem:[%s6174_s5 + $0x40] sm:$0xf]  ;;  %v3857_v52 = vld [vmem:[%s6174_s5 + $0x4c] sm:$0xf0]  ;;  %v2850_v55 = vor.u32 %v3893_v47, %v2849_v45 }
  0x21   :  { %110 = vmatmul.bf16.vlgmr.msra.gmra.mxu0 %v33_v44  ;;  %226 = vmatpush.bf16.msra.mxu1 %v2610_v54  ;;  %v2870_v44 = vor.u32 %v3895_v36, %v2867_v37  ;;  %v3855_v53 = vld [vmem:[%s6174_s5 + $0x44] sm:$0xf]  ;;  %v2707_v54 = vld [vmem:[%s6174_s5 + $0x50] sm:$0xf0]  ;;  %v2833_v57 = vld [vmem:[%s6174_s5 + $0x140] sm:$0xf]  ;;  %v2706_v58 = vor.u32 %v3857_v52, %v2705_v51 }
  0x22   :  { %239 = vmatpush.bf16.msra.mxu2 %v2614_v56  ;;  %656 = vmatpush.bf16.msrb.mxu0 %v2914_v9  ;;  %v2854_v56 = vor.u32 %v3891_v48, %v2851_v49  ;;  %v3889_v59 = vld [vmem:[%s6174_s5 + $0x14c] sm:$0xf0]  ;;  %v3887_v60 = vld [vmem:[%s6174_s5 + $0x144] sm:$0xf]  ;;  %v2835_v61 = vld [vmem:[%s6174_s5 + $0x150] sm:$0xf0]  ;;  %v2710_v62 = vor.u32 %v3855_v53, %v2707_v54 }
  0x23   :  { %646 = vmatpush.bf16.msra.mxu3 %v2738_v34  ;;  %v2689_v63 = vld [vmem:[%s6174_s5 + $0x20] sm:$0xf]  ;;  %v3851_v2 = vld [vmem:[%s6174_s5 + $0x24] sm:$0xf]  ;;  %v2691_v3 = vld [vmem:[%s6174_s5 + $0x30] sm:$0xf0]  ;;  %v2834_v4 = vor.u32 %v3889_v59, %v2833_v57  ;;  %v2838_v5 = vor.u32 %v3887_v60, %v2835_v61 }
  0x24   :  { %v4136_v1 = vld [vmem:[%s6171_s2] ss:$0 sm:$0xff]  ;;  %v3849_v9 = vld [vmem:[%s6174_s5 + $0xc] sm:$0xf0]  ;;  %v3883_v11 = vld [vmem:[%s6174_s5 + $0x124] sm:$0xf]  ;;  %v2694_v14 = vor.u32 %v3851_v2, %v2691_v3 }
  0x25   :  { %669 = vmatpush.bf16.msrb.mxu1 %v2790_v0  ;;  %v3853_v0 = vld [vmem:[%s6174_s5 + $0x2c] sm:$0xf0]  ;;  %v2817_v6 = vld [vmem:[%s6174_s5 + $0x120] sm:$0xf]  ;;  %v2819_v12 = vld [vmem:[%s6174_s5 + $0x130] sm:$0xf0] }
  0x26   :  { %682 = vmatpush.bf16.msrb.mxu2 %v2918_v10  ;;  %657 = vmatpush.bf16.msrb.mxu0 %v2898_v17  ;;  %v2690_v7 = vor.u32 %v3853_v0, %v2689_v63  ;;  %v3885_v10 = vld [vmem:[%s6174_s5 + $0x12c] sm:$0xf0]  ;;  %v3847_v15 = vld [vmem:[%s6174_s5 + $0x4] sm:$0xf]  ;;  %v2675_v16 = vld [vmem:[%s6174_s5 + $0x10] sm:$0xf0]  ;;  %v2822_v23 = vor.u32 %v3883_v11, %v2819_v12 }
  0x27   :  { %647 = vmatpush.bf16.msra.mxu3 %v2722_v46  ;;  %v2793_v17 = vld [vmem:[%s6174_s5 + $0xe8] sm:$0xf]  ;;  %v3878_v19 = vld [vmem:[%s6174_s5 + $0xf4] sm:$0xf0]  ;;  %v3876_v20 = vld [vmem:[%s6174_s5 + $0xec] sm:$0xf]  ;;  %v2818_v22 = vor.u32 %v3885_v10, %v2817_v6 }
  0x28   :  { %v3881_v25 = vld [vmem:[%s6174_s5 + $0x10c] sm:$0xf0]  ;;  %v3879_v26 = vld [vmem:[%s6174_s5 + $0x104] sm:$0xf]  ;;  %v2803_v28 = vld [vmem:[%s6174_s5 + $0x110] sm:$0xf0]  ;;  %v2794_v36 = vor.u32 %v3878_v19, %v2793_v17 }
  0x29   :  { %670 = vmatpush.bf16.msrb.mxu1 %v2774_v8  ;;  %v2673_v8 = vld [vmem:[%s6174_s5] sm:$0xf]  ;;  %v2921_v29 = vld [vmem:[%s6174_s5 + $0x1e8] sm:$0xf]  ;;  %v3908_v33 = vld [vmem:[%s6174_s5 + $0x1ec] sm:$0xf] }
  0x2a   :  { %683 = vmatpush.bf16.msrb.mxu2 %v2902_v21  ;;  %658 = vmatpush.bf16.msrb.mxu0 %v2882_v31  ;;  %v2795_v21 = vld [vmem:[%s6174_s5 + $0xf8] sm:$0xf0]  ;;  %v2674_v30 = vor.u32 %v3849_v9, %v2673_v8  ;;  %v2678_v31 = vor.u32 %v3847_v15, %v2675_v16  ;;  %v3874_v39 = vld [vmem:[%s6174_s5 + $0xd4] sm:$0xf0]  ;;  %v3872_v40 = vld [vmem:[%s6174_s5 + $0xcc] sm:$0xf] }
  0x2b   :  { %648 = vmatpush.bf16.msra.mxu3 %v2706_v58  ;;  %v2923_v34 = vld [vmem:[%s6174_s5 + $0x1f8] sm:$0xf0]  ;;  %v2798_v37 = vor.u32 %v3876_v20, %v2795_v21  ;;  %v2761_v49 = vld [vmem:[%s6174_s5 + $0xa8] sm:$0xf]  ;;  %v3868_v51 = vld [vmem:[%s6174_s5 + $0xac] sm:$0xf] }
  0x2c   :  { %v2779_v41 = vld [vmem:[%s6174_s5 + $0xd8] sm:$0xf0]  ;;  %v2926_v45 = vor.u32 %v3908_v33, %v2923_v34  ;;  %v3904_v57 = vld [vmem:[%s6174_s5 + $0x1cc] sm:$0xf]  ;;  %v2745_v61 = vld [vmem:[%s6174_s5 + $0x88] sm:$0xf] }
  0x2d   :  { %671 = vmatpush.bf16.msrb.mxu1 %v2758_v24  ;;  %v2801_v24 = vld [vmem:[%s6174_s5 + $0x100] sm:$0xf]  ;;  %v2782_v48 = vor.u32 %v3872_v40, %v2779_v41  ;;  %v2763_v53 = vld [vmem:[%s6174_s5 + $0xb8] sm:$0xf0]  ;;  %v3864_v63 = vld [vmem:[%s6174_s5 + $0x8c] sm:$0xf] }
  0x2e   :  { %684 = vmatpush.bf16.msrb.mxu2 %v2886_v32  ;;  %659 = vmatpush.bf16.msrb.mxu0 %v2866_v43  ;;  %v3910_v32 = vld [vmem:[%s6174_s5 + $0x1f4] sm:$0xf0]  ;;  %v2802_v42 = vor.u32 %v3881_v25, %v2801_v24  ;;  %v2806_v43 = vor.u32 %v3879_v26, %v2803_v28  ;;  %v2766_v54 = vor.u32 %v3868_v51, %v2763_v53  ;;  %v2907_v59 = vld [vmem:[%s6174_s5 + $0x1d8] sm:$0xf0]  ;;  %v2889_v3 = vld [vmem:[%s6174_s5 + $0x1a8] sm:$0xf] }
  0x2f   :  { %649 = vmatpush.bf16.msra.mxu3 %v2690_v7  ;;  %v2910_v60 = vor.u32 %v3904_v57, %v2907_v59  ;;  %v2891_v7 = vld [vmem:[%s6174_s5 + $0x1b8] sm:$0xf0]  ;;  %v2729_v9 = vld [vmem:[%s6174_s5 + $0x68] sm:$0xf]  ;;  %v3862_v10 = vld [vmem:[%s6174_s5 + $0x74] sm:$0xf0] }
  0x30   :  { %v2730_v11 = vor.u32 %v3862_v10, %v2729_v9  ;;  %v3860_v12 = vld [vmem:[%s6174_s5 + $0x6c] sm:$0xf]  ;;  %v2873_v15 = vld [vmem:[%s6174_s5 + $0x188] sm:$0xf]  ;;  %v3898_v16 = vld [vmem:[%s6174_s5 + $0x194] sm:$0xf0] }
  0x31   :  { %672 = vmatpush.bf16.msrb.mxu1 %v2742_v38  ;;  %v2777_v38 = vld [vmem:[%s6174_s5 + $0xc8] sm:$0xf]  ;;  %v3896_v17 = vld [vmem:[%s6174_s5 + $0x18c] sm:$0xf]  ;;  %v2875_v19 = vld [vmem:[%s6174_s5 + $0x198] sm:$0xf0] }
  0x32   :  { %685 = vmatpush.bf16.msrb.mxu2 %v2870_v44  ;;  %660 = vmatpush.bf16.msrb.mxu0 %v2850_v55  ;;  %v2922_v44 = vor.u32 %v3910_v32, %v2921_v29  ;;  %v2778_v47 = vor.u32 %v3874_v39, %v2777_v38  ;;  %v2905_v55 = vld [vmem:[%s6174_s5 + $0x1c8] sm:$0xf]  ;;  %v2878_v20 = vor.u32 %v3896_v17, %v2875_v19  ;;  %v2715_v25 = vld [vmem:[%s6174_s5 + $0x58] sm:$0xf0]  ;;  %v3894_v28 = vld [vmem:[%s6174_s5 + $0x174] sm:$0xf0] }
  0x33   :  { %650 = vmatpush.bf16.msra.mxu3 %v2674_v30  ;;  %v2713_v21 = vld [vmem:[%s6174_s5 + $0x48] sm:$0xf]  ;;  %v3892_v29 = vld [vmem:[%s6174_s5 + $0x16c] sm:$0xf]  ;;  %v3854_v34 = vld [vmem:[%s6174_s5 + $0x34] sm:$0xf0] }
  0x34   :  { %v2697_v33 = vld [vmem:[%s6174_s5 + $0x28] sm:$0xf]  ;;  %v3890_v39 = vld [vmem:[%s6174_s5 + $0x154] sm:$0xf0]  ;;  %v3884_v53 = vld [vmem:[%s6174_s5 + $0x12c] sm:$0xf] }
  0x35   :  { %673 = vmatpush.bf16.msrb.mxu1 %v2726_v50  ;;  %v3870_v50 = vld [vmem:[%s6174_s5 + $0xb4] sm:$0xf0]  ;;  %v2841_v38 = vld [vmem:[%s6174_s5 + $0x148] sm:$0xf]  ;;  %v3880_v59 = vld [vmem:[%s6174_s5 + $0x10c] sm:$0xf] }
  0x36   :  { %686 = vmatpush.bf16.msrb.mxu2 %v2854_v56  ;;  %661 = vmatpush.bf16.msrb.mxu0 %v2834_v4  ;;  %v2762_v52 = vor.u32 %v3870_v50, %v2761_v49  ;;  %v3906_v56 = vld [vmem:[%s6174_s5 + $0x1d4] sm:$0xf0]  ;;  %v2842_v41 = vor.u32 %v3890_v39, %v2841_v38  ;;  %v2825_v51 = vld [vmem:[%s6174_s5 + $0x128] sm:$0xf]  ;;  %v3097_v10 = vld [vmem:[%s6176_s7 + $0x150] sm:$0xf] }
  0x37   :  { %695 = vmatpush.bf16.msrb.mxu3 %v2794_v36  ;;  %v2906_v58 = vor.u32 %v3906_v56, %v2905_v55  ;;  %v3902_v4 = vld [vmem:[%s6174_s5 + $0x1b4] sm:$0xf0]  ;;  %v2698_v36 = vor.u32 %v3854_v34, %v2697_v33  ;;  %v2827_v55 = vld [vmem:[%s6174_s5 + $0x138] sm:$0xf0]  ;;  %v2809_v57 = vld [vmem:[%s6174_s5 + $0x108] sm:$0xf] }
  0x38   :  { %v2890_v6 = vor.u32 %v3902_v4, %v2889_v3  ;;  %v2830_v56 = vor.u32 %v3884_v53, %v2827_v55  ;;  %v3125_v3 = vld [vmem:[%s6176_s7 + $0x188] sm:$0xf]  ;;  %v3963_v4 = vld [vmem:[%s6176_s7 + $0x1a0] sm:$0xf0]  ;;  %v4012_v34 = vld [vmem:[%s6176_s7 + $0x328] sm:$0xf0] }
  0x39   :  { %674 = vmatpush.bf16.msrb.mxu1 %v2710_v62  ;;  %v3866_v62 = vld [vmem:[%s6174_s5 + $0x94] sm:$0xf0]  ;;  %v3126_v9 = vor.u32 %v3963_v4, %v3125_v3  ;;  %v3349_v17 = vld [vmem:[%s6176_s7 + $0x348] sm:$0xf]  ;;  %v4019_v19 = vld [vmem:[%s6176_s7 + $0x360] sm:$0xf0] }
  0x3a   :  { %687 = vmatpush.bf16.msrb.mxu2 %v2838_v5  ;;  %662 = vmatpush.bf16.msrb.mxu0 %v2818_v22  ;;  %v2746_v0 = vor.u32 %v3866_v62, %v2745_v61  ;;  %v3900_v5 = vld [vmem:[%s6174_s5 + $0x1ac] sm:$0xf]  ;;  %v3858_v22 = vld [vmem:[%s6174_s5 + $0x54] sm:$0xf0]  ;;  %v2811_v61 = vld [vmem:[%s6174_s5 + $0x118] sm:$0xf0] }
  0x3b   :  { %696 = vmatpush.bf16.msrb.mxu3 %v2778_v47  ;;  %v2894_v8 = vor.u32 %v3900_v5, %v2891_v7  ;;  %v2714_v24 = vor.u32 %v3858_v22, %v2713_v21  ;;  %v3848_v47 = vld [vmem:[%s6174_s5 + $0xc] sm:$0xf]  ;;  %v2814_v62 = vor.u32 %v3880_v59, %v2811_v61  ;;  %v3573_v7 = vld [vmem:[%s6176_s7 + $0x508] sm:$0xf]  ;;  %v4131_v21 = vld [vmem:[%s6176_s7 + $0x6e0] sm:$0xf0] }
  0x3c   :  { %v3041_v38 = vld [vmem:[%s6176_s7 + $0xe0] sm:$0xf]  ;;  %v3935_v53 = vld [vmem:[%s6176_s7 + $0xc0] sm:$0xf0]  ;;  %v3998_v59 = vld [vmem:[%s6176_s7 + $0x2b8] sm:$0xf0] }
  0x3d   :  { %675 = vmatpush.bf16.msrb.mxu1 %v2694_v14  ;;  %v4047_v55 = vld [vmem:[%s6176_s7 + $0x440] sm:$0xf0]  ;;  %v4110_v61 = vld [vmem:[%s6176_s7 + $0x638] sm:$0xf0]  ;;  %v4040_v3 = vld [vmem:[%s6176_s7 + $0x408] sm:$0xf0] }
  0x3e   :  { %688 = vmatpush.bf16.msrb.mxu2 %v2822_v23  ;;  %663 = vmatpush.bf16.msrb.mxu0 %v2802_v42  ;;  %v3856_v23 = vld [vmem:[%s6174_s5 + $0x4c] sm:$0xf] }
  0x3f   :  { %697 = vmatpush.bf16.msrb.mxu3 %v2762_v52  ;;  %v2718_v26 = vor.u32 %v3856_v23, %v2715_v25  ;;  %v3888_v42 = vld [vmem:[%s6174_s5 + $0x14c] sm:$0xf]  ;;  %v3886_v52 = vld [vmem:[%s6174_s5 + $0x134] sm:$0xf0]  ;;  %v3949_v25 = vld [vmem:[%s6176_s7 + $0x130] sm:$0xf0] }
  0x41   :  { %676 = vmatpush.bf16.msrb.mxu1 %v2678_v31  ;;  %v2859_v31 = vld [vmem:[%s6174_s5 + $0x178] sm:$0xf0] }
  0x42   :  { %689 = vmatpush.bf16.msrb.mxu2 %v2806_v43  ;;  %708 = vmatpush.bf16.msra.mxu0 %v2922_v44  ;;  %v2862_v32 = vor.u32 %v3892_v29, %v2859_v31  ;;  %v2843_v43 = vld [vmem:[%s6174_s5 + $0x158] sm:$0xf0]  ;;  %v2681_v44 = vld [vmem:[%s6174_s5 + $0x8] sm:$0xf]  ;;  %v4061_v29 = vld [vmem:[%s6176_s7 + $0x4b0] sm:$0xf0] }
  0x43   :  { %698 = vmatpush.bf16.msrb.mxu3 %v2746_v0  ;;  %v3321_v31 = vld [vmem:[%s6176_s7 + $0x310] sm:$0xf] }
  0x46   :  { %709 = vmatpush.bf16.msra.mxu0 %v2906_v58  ;;  %v3882_v58 = vld [vmem:[%s6174_s5 + $0x114] sm:$0xf0] }
  0x47   :  { %699 = vmatpush.bf16.msrb.mxu3 %v2730_v11 }
  0x4a   :  { %710 = vmatpush.bf16.msra.mxu0 %v2890_v6 }
  0x4b   :  { %700 = vmatpush.bf16.msrb.mxu3 %v2714_v24  ;;  %v3069_v24 = vld [vmem:[%s6176_s7 + $0x118] sm:$0xf] }
  0x4f   :  { %701 = vmatpush.bf16.msrb.mxu3 %v2698_v36  ;;  %v4124_v36 = vld [vmem:[%s6176_s7 + $0x6a8] sm:$0xf0] }
  0x9e   :  { %v111_v13 = vpop.f32.mrf.mxu0 }
  0x9f   :  { %v112_v18 = vadd.f32 %v4136_v1, %v111_v13  ;;  %v2747_v1 = vld [vmem:[%s6174_s5 + $0x98] sm:$0xf0] }
  0xa0   :  { %v2750_v2 = vor.u32 %v3864_v63, %v2747_v1  ;;  %v2731_v13 = vld [vmem:[%s6174_s5 + $0x78] sm:$0xf0]  ;;  %v133_v63 = vld [vmem:[%s6173_s4] sm:$0x3] }
  0xa1   :  { %v115_v27 = vmax.f32 %v112_v18, 0.0  ;;  %v2734_v14 = vor.u32 %v3860_v12, %v2731_v13  ;;  %v2874_v18 = vor.u32 %v3898_v16, %v2873_v15  ;;  %v135_v0 = vperm.slane %v133_v63, 0  ;;  %v3956_v13 = vld [vmem:[%s6176_s7 + $0x168] sm:$0xf0] }
  0xa2   :  { %v136_v6 = vperm.slane %v133_v63, 1  ;;  %v4068_v15 = vld [vmem:[%s6176_s7 + $0x4e8] sm:$0xf0]  ;;  %v3098_v23 = vor.u32 %v3956_v13, %v3097_v10  ;;  %v2985_v63 = vld [vmem:[%s6176_s7 + $0x70] sm:$0xf] }
  0xa3   :  { %v116_v35 = vpack.c.bf16 %v115_v27, %v115_v27  ;;  %711 = vmatpush.bf16.msra.mxu0 %v2874_v18  ;;  %v2857_v27 = vld [vmem:[%s6174_s5 + $0x168] sm:$0xf]  ;;  %v3921_v13 = vld [vmem:[%s6176_s7 + $0x50] sm:$0xf0] }
  0xa4   :  { %v2858_v30 = vor.u32 %v3894_v28, %v2857_v27  ;;  %v3517_v28 = vld [vmem:[%s6176_s7 + $0x498] sm:$0xf] }
  0xa5   :  { %227 = vmatmul.bf16.vlgmr.msra.gmra.mxu1 %v116_v35  ;;  %240 = vmatmul.bf16.vlgmr.msra.gmra.mxu2 %v116_v35  ;;  %v3852_v35 = vld [vmem:[%s6174_s5 + $0x2c] sm:$0xf]  ;;  %v3518_v39 = vor.u32 %v4061_v29, %v3517_v28  ;;  %v3127_v28 = vld [vmem:[%s6176_s7 + $0x1a4] sm:$0xf0] }
  0xa6   :  { %v113_v46 = vpop.f32.mrf.mxu0  ;;  %721 = vmatpush.bf16.msra.mxu1 %v2798_v37  ;;  %734 = vmatpush.bf16.msra.mxu2 %v2926_v45  ;;  %v2699_v37 = vld [vmem:[%s6174_s5 + $0x38] sm:$0xf0]  ;;  %v2846_v45 = vor.u32 %v3888_v42, %v2843_v43 }
  0xa7   :  { %712 = vmatpush.bf16.msra.mxu0 %v2858_v30  ;;  %v2702_v40 = vor.u32 %v3852_v35, %v2699_v37  ;;  %v3850_v46 = vld [vmem:[%s6174_s5 + $0x14] sm:$0xf0]  ;;  %v3350_v30 = vor.u32 %v4019_v19, %v3349_v17  ;;  %v3769_v35 = vld [vmem:[%s6176_s7 + $0x690] sm:$0xf]  ;;  %v3070_v37 = vor.u32 %v3949_v25, %v3069_v24  ;;  %v4054_v42 = vld [vmem:[%s6176_s7 + $0x478] sm:$0xf0] }
  0xa8   :  { %v2682_v49 = vor.u32 %v3850_v46, %v2681_v44  ;;  %v3322_v44 = vor.u32 %v4012_v34, %v3321_v31  ;;  %v3770_v46 = vor.u32 %v4124_v36, %v3769_v35  ;;  %v3209_v17 = vld [vmem:[%s6176_s7 + $0x230] sm:$0xf]  ;;  %v3984_v19 = vld [vmem:[%s6176_s7 + $0x248] sm:$0xf0]  ;;  %v2929_v24 = vld [vmem:[%s6176_s7] sm:$0xf] }
  0xa9   :  { %v3914_v25 = vld [vmem:[%s6176_s7 + $0x18] sm:$0xf0]  ;;  %v3977_v31 = vld [vmem:[%s6176_s7 + $0x210] sm:$0xf0]  ;;  %v3099_v36 = vld [vmem:[%s6176_s7 + $0x16c] sm:$0xf0] }
  0xaa   :  { %722 = vmatpush.bf16.msra.mxu1 %v2782_v48  ;;  %735 = vmatpush.bf16.msra.mxu2 %v2910_v60  ;;  %v2683_v48 = vld [vmem:[%s6174_s5 + $0x18] sm:$0xf0]  ;;  %v2810_v60 = vor.u32 %v3882_v58, %v2809_v57  ;;  %v3265_v57 = vld [vmem:[%s6176_s7 + $0x2a0] sm:$0xf]  ;;  %v3953_v35 = vld [vmem:[%s6176_s7 + $0x154] sm:$0xf] }
  0xab   :  { %v2686_v50 = vor.u32 %v3848_v47, %v2683_v48  ;;  %713 = vmatpush.bf16.msra.mxu0 %v2842_v41  ;;  %702 = vmatpush.bf16.msrb.mxu3 %v2682_v49  ;;  %v3489_v41 = vld [vmem:[%s6176_s7 + $0x460] sm:$0xf]  ;;  %v4005_v47 = vld [vmem:[%s6176_s7 + $0x2f0] sm:$0xf0]  ;;  %v3741_v48 = vld [vmem:[%s6176_s7 + $0x658] sm:$0xf]  ;;  %v3266_v4 = vor.u32 %v3998_v59, %v3265_v57 }
  0xac   :  { %v4117_v49 = vld [vmem:[%s6176_s7 + $0x670] sm:$0xf0]  ;;  %v4026_v57 = vld [vmem:[%s6176_s7 + $0x398] sm:$0xf0] }
  0xad   :  { %v3742_v58 = vor.u32 %v4117_v49, %v3741_v48  ;;  %v3939_v49 = vld [vmem:[%s6176_s7 + $0xe4] sm:$0xf] }
  0xae   :  { %723 = vmatpush.bf16.msra.mxu1 %v2766_v54  ;;  %736 = vmatpush.bf16.msra.mxu2 %v2894_v8  ;;  %v2826_v54 = vor.u32 %v3886_v52, %v2825_v51  ;;  %v4075_v8 = vld [vmem:[%s6176_s7 + $0x520] sm:$0xf0]  ;;  %v3013_v51 = vld [vmem:[%s6176_s7 + $0xa8] sm:$0xf]  ;;  %v3490_v52 = vor.u32 %v4054_v42, %v3489_v41  ;;  %v3102_v41 = vor.u32 %v3953_v35, %v3099_v36  ;;  %v2931_v35 = vld [vmem:[%s6176_s7 + $0x1c] sm:$0xf0] }
  0xaf   :  { %v3574_v11 = vor.u32 %v4075_v8, %v3573_v7  ;;  %v3991_v7 = vld [vmem:[%s6176_s7 + $0x280] sm:$0xf0]  ;;  %v3685_v8 = vld [vmem:[%s6176_s7 + $0x5e8] sm:$0xf]  ;;  %v3974_v36 = vld [vmem:[%s6176_s7 + $0x1fc] sm:$0xf] }
  0xb0   :  { %714 = vmatpush.bf16.msra.mxu0 %v2826_v54  ;;  %v3461_v54 = vld [vmem:[%s6176_s7 + $0x428] sm:$0xf] }
  0xb2   :  { %724 = vmatpush.bf16.msra.mxu1 %v2750_v2  ;;  %737 = vmatpush.bf16.msra.mxu2 %v2878_v20  ;;  %v3797_v20 = vld [vmem:[%s6176_s7 + $0x6c8] sm:$0xf] }
  0xb4   :  { %715 = vmatpush.bf16.msra.mxu0 %v2810_v60  ;;  %v3713_v60 = vld [vmem:[%s6176_s7 + $0x620] sm:$0xf] }
  0xb6   :  { %725 = vmatpush.bf16.msra.mxu1 %v2734_v14  ;;  %738 = vmatpush.bf16.msra.mxu2 %v2862_v32  ;;  %v3545_v14 = vld [vmem:[%s6176_s7 + $0x4d0] sm:$0xf]  ;;  %v3798_v32 = vor.u32 %v4131_v21, %v3797_v20  ;;  %v4096_v21 = vld [vmem:[%s6176_s7 + $0x5c8] sm:$0xf0] }
  0xb7   :  { %v3657_v20 = vld [vmem:[%s6176_s7 + $0x5b0] sm:$0xf] }
  0xb8   :  { %v3658_v29 = vor.u32 %v4096_v21, %v3657_v20  ;;  %v3799_v20 = vld [vmem:[%s6176_s7 + $0x6e4] sm:$0xf0] }
  0xba   :  { %726 = vmatpush.bf16.msra.mxu1 %v2718_v26  ;;  %739 = vmatpush.bf16.msra.mxu2 %v2846_v45  ;;  %v3546_v26 = vor.u32 %v4068_v15, %v3545_v14  ;;  %v3293_v45 = vld [vmem:[%s6176_s7 + $0x2d8] sm:$0xf]  ;;  %v4033_v15 = vld [vmem:[%s6176_s7 + $0x3d0] sm:$0xf0] }
  0xbb   :  { %v3405_v14 = vld [vmem:[%s6176_s7 + $0x3b8] sm:$0xf] }
  0xbe   :  { %727 = vmatpush.bf16.msra.mxu1 %v2702_v40  ;;  %740 = vmatpush.bf16.msra.mxu2 %v2830_v56  ;;  %v3942_v40 = vld [vmem:[%s6176_s7 + $0xf8] sm:$0xf0]  ;;  %v3294_v56 = vor.u32 %v4005_v47, %v3293_v45  ;;  %v3323_v47 = vld [vmem:[%s6176_s7 + $0x32c] sm:$0xf0] }
  0xc2   :  { %728 = vmatpush.bf16.msra.mxu1 %v2686_v50  ;;  %741 = vmatpush.bf16.msra.mxu2 %v2814_v62  ;;  %v3042_v50 = vor.u32 %v3942_v40, %v3041_v38  ;;  %v3014_v62 = vor.u32 %v3935_v53, %v3013_v51  ;;  %v3970_v38 = vld [vmem:[%s6176_s7 + $0x1d8] sm:$0xf0]  ;;  %v3351_v40 = vld [vmem:[%s6176_s7 + $0x364] sm:$0xf0]  ;;  %v3295_v53 = vld [vmem:[%s6176_s7 + $0x2f4] sm:$0xf0] }
 0x122   :  { %v228_v1 = vpop.f32.mrf.mxu1 }
 0x123   :  { %v229_v2 = vadd.f32 %v228_v1, %v135_v0  ;;  %v3462_v0 = vor.u32 %v4047_v55, %v3461_v54  ;;  %v3928_v1 = vld [vmem:[%s6176_s7 + $0x88] sm:$0xf0] }
 0x124   :  { %v2986_v10 = vor.u32 %v3928_v1, %v2985_v63  ;;  %v3995_v1 = vld [vmem:[%s6176_s7 + $0x2a4] sm:$0xf] }
 0x125   :  { %v245_v5 = vmax.f32 %v229_v2, 0.0  ;;  %v3433_v2 = vld [vmem:[%s6176_s7 + $0x3f0] sm:$0xf] }
 0x127   :  { %v4756_v12 = vpack.c.bf16 %v245_v5, %v245_v5  ;;  %v3237_v5 = vld [vmem:[%s6176_s7 + $0x268] sm:$0xf] }
 0x128   :  { %v241_v16 = vpop.f32.mrf.mxu2 }
 0x129   :  { %v242_v18 = vadd.f32 %v241_v16, %v136_v6  ;;  %651 = vmatmul.bf16.vlgmr.msra.gmra.mxu3 %v4756_v12  ;;  %677 = vmatmul.bf16.vlgmr.msrb.gmra.mxu1 %v4756_v12  ;;  %v3714_v6 = vor.u32 %v4110_v61, %v3713_v60  ;;  %v3238_v16 = vor.u32 %v3991_v7, %v3237_v5  ;;  %v4089_v60 = vld [vmem:[%s6176_s7 + $0x590] sm:$0xf0]  ;;  %v3932_v61 = vld [vmem:[%s6176_s7 + $0xac] sm:$0xf]  ;;  %v3575_v5 = vld [vmem:[%s6176_s7 + $0x524] sm:$0xf0] }
 0x12a   :  { %v230_v22 = vpop.f32.mrf.mxu1  ;;  %2179 = vmatpush.bf16.msra.mxu3 %v3126_v9  ;;  %2205 = vmatpush.bf16.msrb.mxu1 %v3574_v11  ;;  %v4103_v9 = vld [vmem:[%s6176_s7 + $0x600] sm:$0xf0]  ;;  %v2957_v11 = vld [vmem:[%s6176_s7 + $0x38] sm:$0xf]  ;;  %v4082_v7 = vld [vmem:[%s6176_s7 + $0x558] sm:$0xf0] }
 0x12b   :  { %v246_v27 = vmax.f32 %v242_v18, 0.0  ;;  %v3686_v18 = vor.u32 %v4103_v9, %v3685_v8  ;;  %v2958_v22 = vor.u32 %v3921_v13, %v2957_v11  ;;  %v2987_v11 = vld [vmem:[%s6176_s7 + $0x8c] sm:$0xf0] }
 0x12d   :  { %v4796_v33 = vpack.c.bf16 %v246_v27, %v246_v27  ;;  %v3960_v27 = vld [vmem:[%s6176_s7 + $0x18c] sm:$0xf] }
 0x12e   :  { %2180 = vmatpush.bf16.msra.mxu3 %v3098_v23  ;;  %2206 = vmatpush.bf16.msrb.mxu1 %v3546_v26  ;;  %v3406_v23 = vor.u32 %v4033_v15, %v3405_v14  ;;  %v3210_v26 = vor.u32 %v3984_v19, %v3209_v17  ;;  %v3239_v14 = vld [vmem:[%s6176_s7 + $0x284] sm:$0xf0]  ;;  %v4065_v15 = vld [vmem:[%s6176_s7 + $0x4d4] sm:$0xf]  ;;  %v4128_v19 = vld [vmem:[%s6176_s7 + $0x6cc] sm:$0xf] }
 0x12f   :  { %664 = vmatmul.bf16.vlgmr.msrb.gmra.mxu0 %v4796_v33  ;;  %690 = vmatmul.bf16.vlgmr.msrb.gmra.mxu2 %v4796_v33  ;;  %v3802_v21 = vor.u32 %v4128_v19, %v3799_v20 }
 0x130   :  { %v243_v43 = vpop.f32.mrf.mxu2  ;;  %2192 = vmatpush.bf16.msrb.mxu0 %v3350_v30  ;;  %2218 = vmatpush.bf16.msrb.mxu2 %v3798_v32  ;;  %v3181_v30 = vld [vmem:[%s6176_s7 + $0x1f8] sm:$0xf]  ;;  %v2930_v32 = vor.u32 %v3914_v25, %v2929_v24  ;;  %v3981_v24 = vld [vmem:[%s6176_s7 + $0x234] sm:$0xf] }
 0x131   :  { %v3182_v34 = vor.u32 %v3977_v31, %v3181_v30  ;;  %v3946_v43 = vld [vmem:[%s6176_s7 + $0x11c] sm:$0xf]  ;;  %v4121_v31 = vld [vmem:[%s6176_s7 + $0x694] sm:$0xf] }
 0x132   :  { %2181 = vmatpush.bf16.msra.mxu3 %v3070_v37  ;;  %2207 = vmatpush.bf16.msrb.mxu1 %v3518_v39  ;;  %v3153_v37 = vld [vmem:[%s6176_s7 + $0x1c0] sm:$0xf]  ;;  %v4016_v39 = vld [vmem:[%s6176_s7 + $0x34c] sm:$0xf] }
 0x133   :  { %v3154_v42 = vor.u32 %v3970_v38, %v3153_v37  ;;  %v3354_v45 = vor.u32 %v4016_v39, %v3351_v40  ;;  %v3183_v38 = vld [vmem:[%s6176_s7 + $0x214] sm:$0xf0]  ;;  %v4051_v39 = vld [vmem:[%s6176_s7 + $0x464] sm:$0xf]  ;;  %v3491_v40 = vld [vmem:[%s6176_s7 + $0x47c] sm:$0xf0] }
 0x134   :  { %2193 = vmatpush.bf16.msrb.mxu0 %v3322_v44  ;;  %2219 = vmatpush.bf16.msrb.mxu2 %v3770_v46  ;;  %v3071_v44 = vld [vmem:[%s6176_s7 + $0x134] sm:$0xf0]  ;;  %v4009_v46 = vld [vmem:[%s6176_s7 + $0x314] sm:$0xf] }
 0x135   :  { %v3074_v48 = vor.u32 %v3946_v43, %v3071_v44  ;;  %v3326_v51 = vor.u32 %v4009_v46, %v3323_v47  ;;  %v4114_v43 = vld [vmem:[%s6176_s7 + $0x65c] sm:$0xf]  ;;  %v3743_v44 = vld [vmem:[%s6176_s7 + $0x674] sm:$0xf0]  ;;  %v3967_v46 = vld [vmem:[%s6176_s7 + $0x1c4] sm:$0xf] }
 0x136   :  { %2182 = vmatpush.bf16.msra.mxu3 %v3042_v50  ;;  %2208 = vmatpush.bf16.msrb.mxu1 %v3490_v52  ;;  %v3043_v50 = vld [vmem:[%s6176_s7 + $0xfc] sm:$0xf0]  ;;  %v4002_v52 = vld [vmem:[%s6176_s7 + $0x2dc] sm:$0xf] }
 0x137   :  { %v3046_v54 = vor.u32 %v3939_v49, %v3043_v50  ;;  %v3298_v55 = vor.u32 %v4002_v52, %v3295_v53  ;;  %v3155_v47 = vld [vmem:[%s6176_s7 + $0x1dc] sm:$0xf0]  ;;  %v4044_v49 = vld [vmem:[%s6176_s7 + $0x42c] sm:$0xf]  ;;  %v3463_v50 = vld [vmem:[%s6176_s7 + $0x444] sm:$0xf0] }
 0x138   :  { %2194 = vmatpush.bf16.msrb.mxu0 %v3294_v56  ;;  %2220 = vmatpush.bf16.msrb.mxu2 %v3742_v58  ;;  %v3377_v56 = vld [vmem:[%s6176_s7 + $0x380] sm:$0xf]  ;;  %v3629_v58 = vld [vmem:[%s6176_s7 + $0x578] sm:$0xf]  ;;  %v3466_v52 = vor.u32 %v4044_v49, %v3463_v50  ;;  %v3943_v49 = vld [vmem:[%s6176_s7 + $0x100] sm:$0xf0] }
 0x139   :  { %703 = vmatmul.bf16.vlgmr.msrb.gmra.mxu3 %v4756_v12  ;;  %729 = vmatmul.bf16.vlgmr.msra.gmra.mxu1 %v4756_v12  ;;  %v3434_v12 = vor.u32 %v4040_v3, %v3433_v2  ;;  %v3378_v59 = vor.u32 %v4026_v57, %v3377_v56  ;;  %v3630_v63 = vor.u32 %v4089_v60, %v3629_v58  ;;  %v3267_v2 = vld [vmem:[%s6176_s7 + $0x2bc] sm:$0xf0]  ;;  %v4072_v3 = vld [vmem:[%s6176_s7 + $0x50c] sm:$0xf]  ;;  %v3435_v56 = vld [vmem:[%s6176_s7 + $0x40c] sm:$0xf0] }
 0x13a   :  { %2183 = vmatpush.bf16.msra.mxu3 %v3014_v62  ;;  %2209 = vmatpush.bf16.msrb.mxu1 %v3462_v0  ;;  %v3015_v62 = vld [vmem:[%s6176_s7 + $0xc4] sm:$0xf0]  ;;  %v3578_v8 = vor.u32 %v4072_v3, %v3575_v5  ;;  %v3715_v53 = vld [vmem:[%s6176_s7 + $0x63c] sm:$0xf0]  ;;  %v4100_v58 = vld [vmem:[%s6176_s7 + $0x5ec] sm:$0xf] }
 0x13b   :  { %v3018_v0 = vor.u32 %v3932_v61, %v3015_v62  ;;  %v4030_v61 = vld [vmem:[%s6176_s7 + $0x3bc] sm:$0xf]  ;;  %v3407_v62 = vld [vmem:[%s6176_s7 + $0x3d4] sm:$0xf0]  ;;  %v4023_v3 = vld [vmem:[%s6176_s7 + $0x384] sm:$0xf] }
 0x13c   :  { %2195 = vmatpush.bf16.msrb.mxu0 %v3266_v4  ;;  %2221 = vmatpush.bf16.msrb.mxu2 %v3714_v6  ;;  %v3270_v4 = vor.u32 %v3995_v1, %v3267_v2  ;;  %v3601_v6 = vld [vmem:[%s6176_s7 + $0x540] sm:$0xf]  ;;  %v3659_v1 = vld [vmem:[%s6176_s7 + $0x5cc] sm:$0xf0]  ;;  %v4086_v5 = vld [vmem:[%s6176_s7 + $0x57c] sm:$0xf] }
 0x13d   :  { %v3602_v9 = vor.u32 %v4082_v7, %v3601_v6  ;;  %v3631_v7 = vld [vmem:[%s6176_s7 + $0x594] sm:$0xf0]  ;;  %v3301_v50 = vld [vmem:[%s6176_s7 + $0x2e0] sm:$0xf] }
 0x13e   :  { %2184 = vmatpush.bf16.msra.mxu3 %v2986_v10  ;;  %2210 = vmatpush.bf16.msrb.mxu1 %v3434_v12  ;;  %v3925_v10 = vld [vmem:[%s6176_s7 + $0x74] sm:$0xf]  ;;  %v3988_v12 = vld [vmem:[%s6176_s7 + $0x26c] sm:$0xf] }
 0x13f   :  { %716 = vmatmul.bf16.vlgmr.msra.gmra.mxu0 %v4796_v33  ;;  %742 = vmatmul.bf16.vlgmr.msra.gmra.mxu2 %v4796_v33  ;;  %v3130_v33 = vor.u32 %v3960_v27, %v3127_v28  ;;  %v2990_v13 = vor.u32 %v3925_v10, %v2987_v11  ;;  %v3242_v17 = vor.u32 %v3988_v12, %v3239_v14  ;;  %v4058_v27 = vld [vmem:[%s6176_s7 + $0x49c] sm:$0xf]  ;;  %v3519_v28 = vld [vmem:[%s6176_s7 + $0x4b4] sm:$0xf0]  ;;  %v4079_v10 = vld [vmem:[%s6176_s7 + $0x544] sm:$0xf] }
 0x140   :  { %2196 = vmatpush.bf16.msrb.mxu0 %v3238_v16  ;;  %2222 = vmatpush.bf16.msrb.mxu2 %v3686_v18  ;;  %v3547_v16 = vld [vmem:[%s6176_s7 + $0x4ec] sm:$0xf0]  ;;  %v3522_v30 = vor.u32 %v4058_v27, %v3519_v28  ;;  %v3603_v11 = vld [vmem:[%s6176_s7 + $0x55c] sm:$0xf0]  ;;  %v3105_v27 = vld [vmem:[%s6176_s7 + $0x158] sm:$0xf] }
 0x141   :  { %v3550_v18 = vor.u32 %v4065_v15, %v3547_v16  ;;  %v5140_v12 = vld [vmem:[%s6175_s6] sm:$0xf] }
 0x142   :  { %2185 = vmatpush.bf16.msra.mxu3 %v2958_v22  ;;  %2211 = vmatpush.bf16.msrb.mxu1 %v3406_v23  ;;  %v3918_v22 = vld [vmem:[%s6176_s7 + $0x3c] sm:$0xf]  ;;  %v2959_v23 = vld [vmem:[%s6176_s7 + $0x54] sm:$0xf0]  ;;  %v315_v14 = vperm.slane %v5140_v12, 0 }
 0x143   :  { %v2962_v25 = vor.u32 %v3918_v22, %v2959_v23  ;;  %v3964_v22 = vld [vmem:[%s6176_s7 + $0x1a8] sm:$0xf0] }
 0x144   :  { %2197 = vmatpush.bf16.msrb.mxu0 %v3210_v26  ;;  %2223 = vmatpush.bf16.msrb.mxu2 %v3658_v29  ;;  %v3211_v26 = vld [vmem:[%s6176_s7 + $0x24c] sm:$0xf0] }
 0x145   :  { %v3214_v29 = vor.u32 %v3981_v24, %v3211_v26 }
 0x146   :  { %2186 = vmatpush.bf16.msra.mxu3 %v2930_v32  ;;  %2212 = vmatpush.bf16.msrb.mxu1 %v3378_v59  ;;  %v3771_v32 = vld [vmem:[%s6176_s7 + $0x6ac] sm:$0xf0]  ;;  %v3687_v59 = vld [vmem:[%s6176_s7 + $0x604] sm:$0xf0] }
 0x147   :  { %v3690_v60 = vor.u32 %v4100_v58, %v3687_v59  ;;  %v3021_v59 = vld [vmem:[%s6176_s7 + $0xb0] sm:$0xf] }
 0x148   :  { %2198 = vmatpush.bf16.msrb.mxu0 %v3182_v34  ;;  %2224 = vmatpush.bf16.msrb.mxu2 %v3630_v63  ;;  %v3911_v34 = vld [vmem:[%s6176_s7 + $0x4] sm:$0xf]  ;;  %v4093_v63 = vld [vmem:[%s6176_s7 + $0x5b4] sm:$0xf] }
 0x149   :  { %v2934_v37 = vor.u32 %v3911_v34, %v2931_v35  ;;  %v3662_v2 = vor.u32 %v4093_v63, %v3659_v1  ;;  %v3999_v63 = vld [vmem:[%s6176_s7 + $0x2c0] sm:$0xf0]  ;;  %v4076_v1 = vld [vmem:[%s6176_s7 + $0x528] sm:$0xf0] }
 0x14a   :  { %2231 = vmatpush.bf16.msrb.mxu3 %v3130_v33  ;;  %2257 = vmatpush.bf16.msra.mxu1 %v3578_v8  ;;  %v3774_v33 = vor.u32 %v4121_v31, %v3771_v32  ;;  %v3634_v8 = vor.u32 %v4086_v5, %v3631_v7  ;;  %v3357_v31 = vld [vmem:[%s6176_s7 + $0x350] sm:$0xf]  ;;  %v4020_v32 = vld [vmem:[%s6176_s7 + $0x368] sm:$0xf0]  ;;  %v2993_v7 = vld [vmem:[%s6176_s7 + $0x78] sm:$0xf] }
 0x14c   :  { %2199 = vmatpush.bf16.msrb.mxu0 %v3154_v42  ;;  %2225 = vmatpush.bf16.msrb.mxu2 %v3602_v9  ;;  %v3494_v42 = vor.u32 %v4051_v39, %v3491_v40  ;;  %v3077_v39 = vld [vmem:[%s6176_s7 + $0x120] sm:$0xf] }
 0x14e   :  { %2232 = vmatpush.bf16.msrb.mxu3 %v3102_v41  ;;  %2258 = vmatpush.bf16.msra.mxu1 %v3550_v18  ;;  %v3186_v41 = vor.u32 %v3974_v36, %v3183_v38  ;;  %v3358_v38 = vor.u32 %v4020_v32, %v3357_v31  ;;  %v3525_v31 = vld [vmem:[%s6176_s7 + $0x4a0] sm:$0xf]  ;;  %v4062_v32 = vld [vmem:[%s6176_s7 + $0x4b8] sm:$0xf0] }
 0x150   :  { %2244 = vmatpush.bf16.msra.mxu0 %v3354_v45  ;;  %2270 = vmatpush.bf16.msra.mxu2 %v3802_v21  ;;  %v3746_v45 = vor.u32 %v4114_v43, %v3743_v44  ;;  %v3133_v21 = vld [vmem:[%s6176_s7 + $0x190] sm:$0xf]  ;;  %v4013_v43 = vld [vmem:[%s6176_s7 + $0x330] sm:$0xf0]  ;;  %v317_v44 = vperm.slane %v5140_v12, 2 }
 0x151   :  { %v3134_v26 = vor.u32 %v3964_v22, %v3133_v21 }
 0x152   :  { %2233 = vmatpush.bf16.msrb.mxu3 %v3074_v48  ;;  %2259 = vmatpush.bf16.msra.mxu1 %v3522_v30  ;;  %v3158_v48 = vor.u32 %v3967_v46, %v3155_v47  ;;  %v3957_v30 = vld [vmem:[%s6176_s7 + $0x170] sm:$0xf0] }
 0x154   :  { %2245 = vmatpush.bf16.msra.mxu0 %v3326_v51  ;;  %2271 = vmatpush.bf16.msra.mxu2 %v3774_v33  ;;  %v4107_v51 = vld [vmem:[%s6176_s7 + $0x624] sm:$0xf] }
 0x156   :  { %2234 = vmatpush.bf16.msrb.mxu3 %v3046_v54  ;;  %2260 = vmatpush.bf16.msra.mxu1 %v3494_v42  ;;  %v3718_v54 = vor.u32 %v4107_v51, %v3715_v53  ;;  %v3329_v42 = vld [vmem:[%s6176_s7 + $0x318] sm:$0xf]  ;;  %v4006_v51 = vld [vmem:[%s6176_s7 + $0x2f8] sm:$0xf0] }
 0x157   :  { %v3330_v47 = vor.u32 %v4013_v43, %v3329_v42  ;;  %v3302_v58 = vor.u32 %v4006_v51, %v3301_v50  ;;  %v3189_v43 = vld [vmem:[%s6176_s7 + $0x200] sm:$0xf]  ;;  %v3135_v50 = vld [vmem:[%s6176_s7 + $0x1ac] sm:$0xf0] }
 0x158   :  { %2246 = vmatpush.bf16.msra.mxu0 %v3298_v55  ;;  %2272 = vmatpush.bf16.msra.mxu2 %v3746_v45  ;;  %v4037_v55 = vld [vmem:[%s6176_s7 + $0x3f4] sm:$0xf] }
 0x159   :  { %v3438_v57 = vor.u32 %v4037_v55, %v3435_v56 }
 0x15a   :  { %2235 = vmatpush.bf16.msrb.mxu3 %v3018_v0  ;;  %2261 = vmatpush.bf16.msra.mxu1 %v3466_v52  ;;  %v3410_v0 = vor.u32 %v4030_v61, %v3407_v62  ;;  %v3936_v61 = vld [vmem:[%s6176_s7 + $0xc8] sm:$0xf0]  ;;  %v3273_v62 = vld [vmem:[%s6176_s7 + $0x2a8] sm:$0xf] }
 0x15b   :  { %v3022_v5 = vor.u32 %v3936_v61, %v3021_v59  ;;  %v4111_v61 = vld [vmem:[%s6176_s7 + $0x640] sm:$0xf0] }
 0x15c   :  { %2247 = vmatpush.bf16.msra.mxu0 %v3270_v4  ;;  %2273 = vmatpush.bf16.msra.mxu2 %v3718_v54  ;;  %v3379_v4 = vld [vmem:[%s6176_s7 + $0x39c] sm:$0xf0]  ;;  %v318_v54 = vperm.slane %v5140_v12, 3 }
 0x15d   :  { %v3382_v6 = vor.u32 %v4023_v3, %v3379_v4 }
 0x15e   :  { %2236 = vmatpush.bf16.msrb.mxu3 %v2990_v13  ;;  %2262 = vmatpush.bf16.msra.mxu1 %v3438_v57  ;;  %v3606_v13 = vor.u32 %v4079_v10, %v3603_v11 }
 0x160   :  { %2248 = vmatpush.bf16.msra.mxu0 %v3242_v17  ;;  %2274 = vmatpush.bf16.msra.mxu2 %v3690_v60  ;;  %v316_v17 = vperm.slane %v5140_v12, 1  ;;  %v3245_v12 = vld [vmem:[%s6176_s7 + $0x270] sm:$0xf] }
 0x162   :  { %2237 = vmatpush.bf16.msrb.mxu3 %v2962_v25  ;;  %2263 = vmatpush.bf16.msra.mxu1 %v3410_v0  ;;  %v3581_v0 = vld [vmem:[%s6176_s7 + $0x510] sm:$0xf] }
 0x163   :  { %v3582_v11 = vor.u32 %v4076_v1, %v3581_v0  ;;  %v4017_v0 = vld [vmem:[%s6176_s7 + $0x354] sm:$0xf]  ;;  %v3359_v1 = vld [vmem:[%s6176_s7 + $0x36c] sm:$0xf0] }
 0x164   :  { %2249 = vmatpush.bf16.msra.mxu0 %v3214_v29  ;;  %2275 = vmatpush.bf16.msra.mxu2 %v3662_v2 }
 0x166   :  { %2238 = vmatpush.bf16.msrb.mxu3 %v2934_v37  ;;  %2264 = vmatpush.bf16.msra.mxu1 %v3382_v6  ;;  %v3106_v37 = vor.u32 %v3957_v30, %v3105_v27  ;;  %v3274_v6 = vor.u32 %v3999_v63, %v3273_v62  ;;  %v3985_v30 = vld [vmem:[%s6176_s7 + $0x250] sm:$0xf0]  ;;  %v3954_v62 = vld [vmem:[%s6176_s7 + $0x15c] sm:$0xf]  ;;  %v3107_v63 = vld [vmem:[%s6176_s7 + $0x174] sm:$0xf0] }
 0x168   :  { %2250 = vmatpush.bf16.msra.mxu0 %v3186_v41  ;;  %2276 = vmatpush.bf16.msra.mxu2 %v3634_v8  ;;  %v3950_v41 = vld [vmem:[%s6176_s7 + $0x138] sm:$0xf0]  ;;  %v3929_v8 = vld [vmem:[%s6176_s7 + $0x90] sm:$0xf0] }
 0x169   :  { %v3078_v46 = vor.u32 %v3950_v41, %v3077_v39  ;;  %v2994_v21 = vor.u32 %v3929_v8, %v2993_v7  ;;  %v3915_v39 = vld [vmem:[%s6176_s7 + $0x20] sm:$0xf0]  ;;  %v3526_v41 = vor.u32 %v4062_v32, %v3525_v31  ;;  %v3110_v7 = vor.u32 %v3954_v62, %v3107_v63  ;;  %v3385_v32 = vld [vmem:[%s6176_s7 + $0x388] sm:$0xf] }
 0x16a   :  { %v3362_v8 = vor.u32 %v4017_v0, %v3359_v1  ;;  %v3919_v63 = vld [vmem:[%s6176_s7 + $0x44] sm:$0xf]  ;;  %v2967_v0 = vld [vmem:[%s6176_s7 + $0x5c] sm:$0xf0] }
 0x16c   :  { %2251 = vmatpush.bf16.msra.mxu0 %v3158_v48  ;;  %2277 = vmatpush.bf16.msra.mxu2 %v3606_v13  ;;  %v3049_v48 = vld [vmem:[%s6176_s7 + $0xe8] sm:$0xf]  ;;  %v3992_v13 = vld [vmem:[%s6176_s7 + $0x288] sm:$0xf0] }
 0x16d   :  { %v3050_v57 = vor.u32 %v3943_v49, %v3049_v48  ;;  %v3246_v22 = vor.u32 %v3992_v13, %v3245_v12  ;;  %v4118_v48 = vld [vmem:[%s6176_s7 + $0x678] sm:$0xf0]  ;;  %v3961_v49 = vld [vmem:[%s6176_s7 + $0x194] sm:$0xf]  ;;  %v3947_v12 = vld [vmem:[%s6176_s7 + $0x124] sm:$0xf] }
 0x16e   :  { %v3138_v59 = vor.u32 %v3961_v49, %v3135_v50  ;;  %v3079_v13 = vld [vmem:[%s6176_s7 + $0x13c] sm:$0xf0]  ;;  %v4083_v50 = vld [vmem:[%s6176_s7 + $0x560] sm:$0xf0] }
 0x1a6   :  { %v678_v9 = vpop.f32.mrf.mxu1 }
 0x1a7   :  { %v679_v23 = vadd.f32 %v678_v9, %v316_v17  ;;  %v4069_v17 = vld [vmem:[%s6176_s7 + $0x4f0] sm:$0xf0] }
 0x1ac   :  { %v652_v15 = vpop.f32.mrf.mxu3  ;;  %v665_v16 = vpop.f32.mrf.mxu0 }
 0x1ad   :  { %v653_v18 = vadd.f32 %v652_v15, %v315_v14  ;;  %v3553_v14 = vld [vmem:[%s6176_s7 + $0x4d8] sm:$0xf] }
 0x1ae   :  { %v680_v19 = vpop.f32.mrf.mxu1 }
 0x1af   :  { %v666_v20 = vadd.f32 %v665_v16, %v653_v18  ;;  %v3805_v18 = vld [vmem:[%s6176_s7 + $0x6d0] sm:$0xf]  ;;  %v4132_v19 = vld [vmem:[%s6176_s7 + $0x6e8] sm:$0xf0] }
 0x1b0   :  { %v3806_v27 = vor.u32 %v4132_v19, %v3805_v18  ;;  %v3413_v18 = vld [vmem:[%s6176_s7 + $0x3c0] sm:$0xf]  ;;  %v4034_v19 = vld [vmem:[%s6176_s7 + $0x3d8] sm:$0xf0] }
 0x1b1   :  { %v747_v24 = vmax.f32 %v666_v20, 0.0 }
 0x1b2   :  { %v691_v25 = vpop.f32.mrf.mxu2 }
 0x1b3   :  { %v5153_v28 = vpack.c.bf16 %v747_v24, %v747_v24  ;;  %v692_v29 = vadd.f32 %v691_v25, %v679_v23  ;;  %v2965_v23 = vld [vmem:[%s6176_s7 + $0x40] sm:$0xf]  ;;  %v3922_v24 = vld [vmem:[%s6176_s7 + $0x58] sm:$0xf0] }
 0x1b4   :  { %v654_v33 = vpop.f32.mrf.mxu3  ;;  %v667_v34 = vpop.f32.mrf.mxu0 }
 0x1b5   :  { %v748_v35 = vmax.f32 %v692_v29, 0.0  ;;  %2187 = vmatmul.bf16.vlgmr.msra.gmra.mxu3 %v5153_v28  ;;  %v3217_v29 = vld [vmem:[%s6176_s7 + $0x238] sm:$0xf]  ;;  %v4125_v34 = vld [vmem:[%s6176_s7 + $0x6b0] sm:$0xf0] }
 0x1b6   :  { %2283 = vmatpush.bf16.msra.mxu3 %v3134_v26  ;;  %v730_v36 = vpop.f32.mrf.mxu1  ;;  %v3554_v26 = vor.u32 %v4069_v17, %v3553_v14  ;;  %v3777_v33 = vld [vmem:[%s6176_s7 + $0x698] sm:$0xf]  ;;  %v4010_v14 = vld [vmem:[%s6176_s7 + $0x31c] sm:$0xf] }
 0x1b7   :  { %v5168_v40 = vpack.c.bf16 %v748_v35, %v748_v35  ;;  %v731_v2 = vadd.f32 %v730_v36, %v318_v54  ;;  %v2966_v36 = vor.u32 %v3922_v24, %v2965_v23  ;;  %v3778_v42 = vor.u32 %v4125_v34, %v3777_v33  ;;  %v4097_v23 = vld [vmem:[%s6176_s7 + $0x5d0] sm:$0xf0]  ;;  %v3940_v24 = vld [vmem:[%s6176_s7 + $0xec] sm:$0xf]  ;;  %v4027_v33 = vld [vmem:[%s6176_s7 + $0x3a0] sm:$0xf0] }
 0x1b9   :  { %2200 = vmatmul.bf16.vlgmr.msrb.gmra.mxu0 %v5168_v40 }
 0x1ba   :  { %2284 = vmatpush.bf16.msra.mxu3 %v3106_v37  ;;  %2296 = vmatpush.bf16.msrb.mxu0 %v3358_v38  ;;  %v693_v45 = vpop.f32.mrf.mxu2  ;;  %v3218_v37 = vor.u32 %v3985_v30, %v3217_v29  ;;  %v2937_v38 = vld [vmem:[%s6176_s7 + $0x8] sm:$0xf]  ;;  %v3303_v29 = vld [vmem:[%s6176_s7 + $0x2fc] sm:$0xf0]  ;;  %v3414_v30 = vor.u32 %v4034_v19, %v3413_v18  ;;  %v4052_v18 = vld [vmem:[%s6176_s7 + $0x46c] sm:$0xf] }
 0x1bb   :  { %v3497_v45 = vld [vmem:[%s6176_s7 + $0x468] sm:$0xf]  ;;  %v2938_v51 = vor.u32 %v3915_v39, %v2937_v38  ;;  %v3933_v38 = vld [vmem:[%s6176_s7 + $0xb4] sm:$0xf]  ;;  %v3023_v39 = vld [vmem:[%s6176_s7 + $0xcc] sm:$0xf0] }
 0x1bc   :  { %v704_v52 = vpop.f32.mrf.mxu3  ;;  %v717_v53 = vpop.f32.mrf.mxu0  ;;  %v3499_v19 = vld [vmem:[%s6176_s7 + $0x484] sm:$0xf0] }
 0x1bd   :  { %v705_v55 = vadd.f32 %v704_v52, %v317_v44  ;;  %v3978_v44 = vld [vmem:[%s6176_s7 + $0x218] sm:$0xf0] }
 0x1be   :  { %2285 = vmatpush.bf16.msra.mxu3 %v3078_v46  ;;  %2297 = vmatpush.bf16.msrb.mxu0 %v3330_v47  ;;  %v732_v56 = vpop.f32.mrf.mxu1  ;;  %v4055_v46 = vld [vmem:[%s6176_s7 + $0x480] sm:$0xf0]  ;;  %v3749_v47 = vld [vmem:[%s6176_s7 + $0x660] sm:$0xf]  ;;  %v3190_v52 = vor.u32 %v3978_v44, %v3189_v43  ;;  %v4073_v43 = vld [vmem:[%s6176_s7 + $0x514] sm:$0xf] }
 0x1bf   :  { %v718_v60 = vadd.f32 %v717_v53, %v705_v55  ;;  %v3161_v53 = vld [vmem:[%s6176_s7 + $0x1c8] sm:$0xf]  ;;  %v3498_v54 = vor.u32 %v4055_v46, %v3497_v45  ;;  %v3750_v55 = vor.u32 %v4118_v48, %v3749_v47  ;;  %v3971_v56 = vld [vmem:[%s6176_s7 + $0x1e0] sm:$0xf0]  ;;  %v3583_v44 = vld [vmem:[%s6176_s7 + $0x52c] sm:$0xf0]  ;;  %v3386_v45 = vor.u32 %v4027_v33, %v3385_v32 }
 0x1c0   :  { %v3609_v47 = vld [vmem:[%s6176_s7 + $0x548] sm:$0xf]  ;;  %v3026_v48 = vor.u32 %v3933_v38, %v3023_v39  ;;  %v4045_v32 = vld [vmem:[%s6176_s7 + $0x434] sm:$0xf]  ;;  %v3471_v33 = vld [vmem:[%s6176_s7 + $0x44c] sm:$0xf0] }
 0x1c1   :  { %v749_v3 = vmax.f32 %v718_v60, 0.0  ;;  %v3721_v60 = vld [vmem:[%s6176_s7 + $0x628] sm:$0xf]  ;;  %v3958_v38 = vld [vmem:[%s6176_s7 + $0x178] sm:$0xf0] }
 0x1c2   :  { %2286 = vmatpush.bf16.msra.mxu3 %v3050_v57  ;;  %2298 = vmatpush.bf16.msrb.mxu0 %v3302_v58  ;;  %v743_v4 = vpop.f32.mrf.mxu2  ;;  %v3469_v57 = vld [vmem:[%s6176_s7 + $0x430] sm:$0xf]  ;;  %v4048_v58 = vld [vmem:[%s6176_s7 + $0x448] sm:$0xf0]  ;;  %v3365_v39 = vld [vmem:[%s6176_s7 + $0x358] sm:$0xf] }
 0x1c3   :  { %v5218_v9 = vpack.c.bf16 %v749_v3, %v749_v3  ;;  %v744_v10 = vadd.f32 %v743_v4, %v731_v2  ;;  %v3162_v2 = vor.u32 %v3971_v56, %v3161_v53  ;;  %v3470_v3 = vor.u32 %v4048_v58, %v3469_v57  ;;  %v4066_v56 = vld [vmem:[%s6176_s7 + $0x4dc] sm:$0xf]  ;;  %v3555_v57 = vld [vmem:[%s6176_s7 + $0x4f4] sm:$0xf0]  ;;  %v4129_v58 = vld [vmem:[%s6176_s7 + $0x6d4] sm:$0xf] }
 0x1c4   :  { %v706_v15 = vpop.f32.mrf.mxu3  ;;  %v719_v16 = vpop.f32.mrf.mxu0  ;;  %v3722_v4 = vor.u32 %v4111_v61, %v3721_v60  ;;  %v3586_v53 = vor.u32 %v4073_v43, %v3583_v44  ;;  %v3610_v60 = vor.u32 %v4083_v50, %v3609_v47  ;;  %v3558_v1 = vor.u32 %v4066_v56, %v3555_v57  ;;  %v3695_v50 = vld [vmem:[%s6176_s7 + $0x60c] sm:$0xf0]  ;;  %v4031_v57 = vld [vmem:[%s6176_s7 + $0x3c4] sm:$0xf] }
 0x1c5   :  { %v750_v20 = vmax.f32 %v744_v10, 0.0  ;;  %2213 = vmatmul.bf16.vlgmr.msrb.gmra.mxu1 %v5218_v9  ;;  %2239 = vmatmul.bf16.vlgmr.msrb.gmra.mxu3 %v5153_v28  ;;  %v3693_v10 = vld [vmem:[%s6176_s7 + $0x5f0] sm:$0xf]  ;;  %v3331_v15 = vld [vmem:[%s6176_s7 + $0x334] sm:$0xf0]  ;;  %v3474_v43 = vor.u32 %v4045_v32, %v3471_v33 }
 0x1c6   :  { %2287 = vmatpush.bf16.msra.mxu3 %v3022_v5  ;;  %2299 = vmatpush.bf16.msrb.mxu0 %v3274_v6  ;;  %v3441_v5 = vld [vmem:[%s6176_s7 + $0x3f8] sm:$0xf]  ;;  %v4041_v6 = vld [vmem:[%s6176_s7 + $0x410] sm:$0xf0]  ;;  %v4070_v32 = vld [vmem:[%s6176_s7 + $0x4f8] sm:$0xf0] }
 0x1c7   :  { %v5246_v25 = vpack.c.bf16 %v750_v20, %v750_v20  ;;  %2309 = vmatpush.bf16.msrb.mxu1 %v3582_v11  ;;  %v4104_v11 = vld [vmem:[%s6176_s7 + $0x608] sm:$0xf0]  ;;  %v3442_v16 = vor.u32 %v4041_v6, %v3441_v5  ;;  %v3082_v20 = vor.u32 %v3947_v12, %v3079_v13  ;;  %v4059_v5 = vld [vmem:[%s6176_s7 + $0x4a4] sm:$0xf]  ;;  %v3527_v6 = vld [vmem:[%s6176_s7 + $0x4bc] sm:$0xf0] }
 0x1c8   :  { %v3694_v17 = vor.u32 %v4104_v11, %v3693_v10  ;;  %v2970_v10 = vor.u32 %v3919_v63, %v2967_v0  ;;  %v3912_v12 = vld [vmem:[%s6176_s7 + $0xc] sm:$0xf]  ;;  %v2939_v13 = vld [vmem:[%s6176_s7 + $0x24] sm:$0xf0]  ;;  %v3057_v63 = vld [vmem:[%s6176_s7 + $0xf0] sm:$0xf] }
 0x1c9   :  { %2226 = vmatmul.bf16.vlgmr.msrb.gmra.mxu2 %v5246_v25  ;;  %2252 = vmatmul.bf16.vlgmr.msra.gmra.mxu0 %v5168_v40  ;;  %v3944_v0 = vld [vmem:[%s6176_s7 + $0x108] sm:$0xf0]  ;;  %v3813_v33 = vld [vmem:[%s6176_s7 + $0x6d8] sm:$0xf] }
 0x1ca   :  { %2288 = vmatpush.bf16.msra.mxu3 %v2994_v21  ;;  %2300 = vmatpush.bf16.msrb.mxu0 %v3246_v22  ;;  %v745_v35 = vpop.f32.mrf.mxu2  ;;  %v3334_v21 = vor.u32 %v4010_v14, %v3331_v15  ;;  %v3665_v22 = vld [vmem:[%s6176_s7 + $0x5b8] sm:$0xf]  ;;  %v3530_v14 = vor.u32 %v4059_v5, %v3527_v6  ;;  %v4024_v5 = vld [vmem:[%s6176_s7 + $0x38c] sm:$0xf]  ;;  %v3387_v6 = vld [vmem:[%s6176_s7 + $0x3a4] sm:$0xf0] }
 0x1cb   :  { %2310 = vmatpush.bf16.msrb.mxu1 %v3554_v26  ;;  %2322 = vmatpush.bf16.msrb.mxu2 %v3806_v27  ;;  %v3051_v26 = vld [vmem:[%s6176_s7 + $0x104] sm:$0xf0]  ;;  %v4003_v27 = vld [vmem:[%s6176_s7 + $0x2e4] sm:$0xf]  ;;  %v3666_v31 = vor.u32 %v4097_v23, %v3665_v22  ;;  %v3141_v22 = vld [vmem:[%s6176_s7 + $0x198] sm:$0xf] }
 0x1cc   :  { %v3054_v34 = vor.u32 %v3940_v24, %v3051_v26  ;;  %v3306_v35 = vor.u32 %v4003_v27, %v3303_v29  ;;  %v3965_v23 = vld [vmem:[%s6176_s7 + $0x1b0] sm:$0xf0]  ;;  %v2942_v24 = vor.u32 %v3912_v12, %v2939_v13  ;;  %v3968_v27 = vld [vmem:[%s6176_s7 + $0x1cc] sm:$0xf]  ;;  %v3502_v29 = vor.u32 %v4052_v18, %v3499_v19  ;;  %v3029_v12 = vld [vmem:[%s6176_s7 + $0xb8] sm:$0xf] }
 0x1cd   :  { %v3937_v13 = vld [vmem:[%s6176_s7 + $0xd0] sm:$0xf0]  ;;  %v3390_v18 = vor.u32 %v4024_v5, %v3387_v6  ;;  %v3477_v5 = vld [vmem:[%s6176_s7 + $0x438] sm:$0xf] }
 0x1ce   :  { %2289 = vmatpush.bf16.msra.mxu3 %v2966_v36  ;;  %2301 = vmatpush.bf16.msrb.mxu0 %v3218_v37  ;;  %v3637_v36 = vld [vmem:[%s6176_s7 + $0x580] sm:$0xf]  ;;  %v4090_v37 = vld [vmem:[%s6176_s7 + $0x598] sm:$0xf0]  ;;  %v4049_v6 = vld [vmem:[%s6176_s7 + $0x450] sm:$0xf0] }
 0x1cf   :  { %2311 = vmatpush.bf16.msrb.mxu1 %v3526_v41  ;;  %2323 = vmatpush.bf16.msrb.mxu2 %v3778_v42  ;;  %v3996_v41 = vld [vmem:[%s6176_s7 + $0x2ac] sm:$0xf]  ;;  %v3275_v42 = vld [vmem:[%s6176_s7 + $0x2c4] sm:$0xf0]  ;;  %v3638_v46 = vor.u32 %v4090_v37, %v3637_v36  ;;  %v3113_v37 = vld [vmem:[%s6176_s7 + $0x160] sm:$0xf] }
 0x1d0   :  { %v3278_v49 = vor.u32 %v3996_v41, %v3275_v42  ;;  %v3723_v36 = vld [vmem:[%s6176_s7 + $0x644] sm:$0xf0]  ;;  %v4021_v41 = vld [vmem:[%s6176_s7 + $0x370] sm:$0xf0]  ;;  %v3114_v47 = vor.u32 %v3958_v38, %v3113_v37 }
 0x1d1   :  { %v2973_v38 = vld [vmem:[%s6176_s7 + $0x48] sm:$0xf] }
 0x1d2   :  { %2290 = vmatpush.bf16.msra.mxu3 %v2938_v51  ;;  %2302 = vmatpush.bf16.msrb.mxu0 %v3190_v52  ;;  %v3926_v51 = vld [vmem:[%s6176_s7 + $0x7c] sm:$0xf]  ;;  %v2995_v52 = vld [vmem:[%s6176_s7 + $0x94] sm:$0xf0] }
 0x1d3   :  { %2312 = vmatpush.bf16.msrb.mxu1 %v3498_v54  ;;  %2324 = vmatpush.bf16.msrb.mxu2 %v3750_v55  ;;  %v3989_v54 = vld [vmem:[%s6176_s7 + $0x274] sm:$0xf]  ;;  %v3247_v55 = vld [vmem:[%s6176_s7 + $0x28c] sm:$0xf0]  ;;  %v2998_v61 = vor.u32 %v3926_v51, %v2995_v52  ;;  %v3085_v51 = vld [vmem:[%s6176_s7 + $0x128] sm:$0xf] }
 0x1d4   :  { %v3250_v62 = vor.u32 %v3989_v54, %v3247_v55  ;;  %v3951_v52 = vld [vmem:[%s6176_s7 + $0x140] sm:$0xf0]  ;;  %v4014_v54 = vld [vmem:[%s6176_s7 + $0x338] sm:$0xf0] }
 0x1d5   :  { %2265 = vmatmul.bf16.vlgmr.msra.gmra.mxu1 %v5218_v9  ;;  %2291 = vmatmul.bf16.vlgmr.msra.gmra.mxu3 %v5153_v28 }
 0x1d6   :  { %2335 = vmatpush.bf16.msrb.mxu3 %v3138_v59  ;;  %2303 = vmatpush.bf16.msrb.mxu0 %v3162_v2  ;;  %v3807_v59 = vld [vmem:[%s6176_s7 + $0x6ec] sm:$0xf0] }
 0x1d7   :  { %2313 = vmatpush.bf16.msrb.mxu1 %v3470_v3  ;;  %2325 = vmatpush.bf16.msrb.mxu2 %v3722_v4  ;;  %v3810_v2 = vor.u32 %v4129_v58, %v3807_v59  ;;  %v3982_v3 = vld [vmem:[%s6176_s7 + $0x23c] sm:$0xf]  ;;  %v3219_v4 = vld [vmem:[%s6176_s7 + $0x254] sm:$0xf0]  ;;  %v3415_v58 = vld [vmem:[%s6176_s7 + $0x3dc] sm:$0xf0]  ;;  %v3086_v59 = vor.u32 %v3951_v52, %v3085_v51 }
 0x1d8   :  { %v3222_v11 = vor.u32 %v3982_v3, %v3219_v4  ;;  %v3418_v3 = vor.u32 %v4031_v57, %v3415_v58  ;;  %v2945_v51 = vld [vmem:[%s6176_s7 + $0x10] sm:$0xf]  ;;  %v3916_v52 = vld [vmem:[%s6176_s7 + $0x28] sm:$0xf0] }
 0x1d9   :  { %2278 = vmatmul.bf16.vlgmr.msra.gmra.mxu2 %v5246_v25  ;;  %2304 = vmatmul.bf16.vlgmr.msrb.gmra.mxu0 %v5168_v40  ;;  %v3505_v57 = vld [vmem:[%s6176_s7 + $0x470] sm:$0xf]  ;;  %v4056_v58 = vld [vmem:[%s6176_s7 + $0x488] sm:$0xf0] }
 0x1da   :  { %2336 = vmatpush.bf16.msrb.mxu3 %v3110_v7  ;;  %2348 = vmatpush.bf16.msra.mxu0 %v3362_v8  ;;  %v4122_v7 = vld [vmem:[%s6176_s7 + $0x69c] sm:$0xf]  ;;  %v3779_v8 = vld [vmem:[%s6176_s7 + $0x6b4] sm:$0xf0] }
 0x1db   :  { %2314 = vmatpush.bf16.msrb.mxu1 %v3442_v16  ;;  %2326 = vmatpush.bf16.msrb.mxu2 %v3694_v17  ;;  %v3782_v15 = vor.u32 %v4122_v7, %v3779_v8  ;;  %v3975_v16 = vld [vmem:[%s6176_s7 + $0x204] sm:$0xf]  ;;  %v3191_v17 = vld [vmem:[%s6176_s7 + $0x21c] sm:$0xf0]  ;;  %v3058_v7 = vor.u32 %v3944_v0, %v3057_v63  ;;  %v2946_v63 = vor.u32 %v3916_v52, %v2945_v51  ;;  %v3934_v51 = vld [vmem:[%s6176_s7 + $0xbc] sm:$0xf] }
 0x1dc   :  { %v3194_v26 = vor.u32 %v3975_v16, %v3191_v17  ;;  %v3589_v16 = vld [vmem:[%s6176_s7 + $0x518] sm:$0xf]  ;;  %v4077_v17 = vld [vmem:[%s6176_s7 + $0x530] sm:$0xf0] }
 0x1dd   :  { %v3031_v52 = vld [vmem:[%s6176_s7 + $0xd4] sm:$0xf0] }
 0x1de   :  { %2337 = vmatpush.bf16.msrb.mxu3 %v3082_v20  ;;  %2349 = vmatpush.bf16.msra.mxu0 %v3334_v21  ;;  %v4115_v20 = vld [vmem:[%s6176_s7 + $0x664] sm:$0xf]  ;;  %v3751_v21 = vld [vmem:[%s6176_s7 + $0x67c] sm:$0xf0] }
 0x1df   :  { %2315 = vmatpush.bf16.msrb.mxu1 %v3414_v30  ;;  %2327 = vmatpush.bf16.msrb.mxu2 %v3666_v31  ;;  %v3754_v30 = vor.u32 %v4115_v20, %v3751_v21  ;;  %v3163_v31 = vld [vmem:[%s6176_s7 + $0x1e4] sm:$0xf0]  ;;  %v4080_v20 = vld [vmem:[%s6176_s7 + $0x54c] sm:$0xf]  ;;  %v3030_v21 = vor.u32 %v3937_v13, %v3029_v12  ;;  %v3115_v12 = vld [vmem:[%s6176_s7 + $0x17c] sm:$0xf0] }
 0x1e0   :  { %v3166_v42 = vor.u32 %v3968_v27, %v3163_v31  ;;  %v3590_v27 = vor.u32 %v4077_v17, %v3589_v16  ;;  %v3561_v31 = vld [vmem:[%s6176_s7 + $0x4e0] sm:$0xf]  ;;  %v4018_v13 = vld [vmem:[%s6176_s7 + $0x35c] sm:$0xf]  ;;  %v3478_v16 = vor.u32 %v4049_v6, %v3477_v5 }
 0x1e1   :  { %v3563_v5 = vld [vmem:[%s6176_s7 + $0x4fc] sm:$0xf0]  ;;  %v4130_v6 = vld [vmem:[%s6176_s7 + $0x6dc] sm:$0xf] }
 0x1e2   :  { %2338 = vmatpush.bf16.msrb.mxu3 %v3054_v34  ;;  %2350 = vmatpush.bf16.msra.mxu0 %v3306_v35  ;;  %v3142_v34 = vor.u32 %v3965_v23, %v3141_v22  ;;  %v4108_v35 = vld [vmem:[%s6176_s7 + $0x62c] sm:$0xf]  ;;  %v3611_v23 = vld [vmem:[%s6176_s7 + $0x564] sm:$0xf0] }
 0x1e3   :  { %2316 = vmatpush.bf16.msrb.mxu1 %v3386_v45  ;;  %2328 = vmatpush.bf16.msrb.mxu2 %v3638_v46  ;;  %v3726_v44 = vor.u32 %v4108_v35, %v3723_v36  ;;  %v4038_v45 = vld [vmem:[%s6176_s7 + $0x3fc] sm:$0xf]  ;;  %v3443_v46 = vld [vmem:[%s6176_s7 + $0x414] sm:$0xf0]  ;;  %v3614_v35 = vor.u32 %v4080_v20, %v3611_v23  ;;  %v4105_v23 = vld [vmem:[%s6176_s7 + $0x610] sm:$0xf0] }
 0x1e4   :  { %v3446_v55 = vor.u32 %v4038_v45, %v3443_v46  ;;  %v3533_v45 = vld [vmem:[%s6176_s7 + $0x4a8] sm:$0xf]  ;;  %v4063_v46 = vld [vmem:[%s6176_s7 + $0x4c0] sm:$0xf0] }
 0x1e6   :  { %2339 = vmatpush.bf16.msrb.mxu3 %v3026_v48  ;;  %2351 = vmatpush.bf16.msra.mxu0 %v3278_v49  ;;  %v3366_v48 = vor.u32 %v4021_v41, %v3365_v39  ;;  %v4101_v49 = vld [vmem:[%s6176_s7 + $0x5f4] sm:$0xf]  ;;  %v3923_v39 = vld [vmem:[%s6176_s7 + $0x60] sm:$0xf0]  ;;  %v3562_v41 = vor.u32 %v4070_v32, %v3561_v31  ;;  %v3421_v32 = vld [vmem:[%s6176_s7 + $0x3c8] sm:$0xf] }
 0x1e7   :  { %2361 = vmatpush.bf16.msra.mxu1 %v3586_v53  ;;  %2329 = vmatpush.bf16.msrb.mxu2 %v3610_v60  ;;  %v3337_v53 = vld [vmem:[%s6176_s7 + $0x320] sm:$0xf]  ;;  %v3698_v56 = vor.u32 %v4101_v49, %v3695_v50  ;;  %v2974_v49 = vor.u32 %v3923_v39, %v2973_v38  ;;  %v3941_v38 = vld [vmem:[%s6176_s7 + $0xf4] sm:$0xf]  ;;  %v3059_v39 = vld [vmem:[%s6176_s7 + $0x10c] sm:$0xf0] }
 0x1e8   :  { %2317 = vmatmul.bf16.vlgmr.msrb.gmra.mxu1 %v5218_v9  ;;  %v3338_v60 = vor.u32 %v4014_v54, %v3337_v53  ;;  %v3534_v53 = vor.u32 %v4063_v46, %v3533_v45  ;;  %v3393_v45 = vld [vmem:[%s6176_s7 + $0x390] sm:$0xf]  ;;  %v4028_v46 = vld [vmem:[%s6176_s7 + $0x3a8] sm:$0xf0] }
 0x1ea   :  { %2340 = vmatpush.bf16.msrb.mxu3 %v2998_v61  ;;  %2352 = vmatpush.bf16.msra.mxu0 %v3250_v62  ;;  %v4094_v61 = vld [vmem:[%s6176_s7 + $0x5bc] sm:$0xf]  ;;  %v3667_v62 = vld [vmem:[%s6176_s7 + $0x5d4] sm:$0xf0] }
 0x1eb   :  { %2362 = vmatpush.bf16.msra.mxu1 %v3558_v1  ;;  %2374 = vmatpush.bf16.msra.mxu2 %v3810_v2  ;;  %v3309_v1 = vld [vmem:[%s6176_s7 + $0x2e8] sm:$0xf]  ;;  %v4007_v2 = vld [vmem:[%s6176_s7 + $0x300] sm:$0xf0]  ;;  %v3670_v4 = vor.u32 %v4094_v61, %v3667_v62  ;;  %v3962_v61 = vld [vmem:[%s6176_s7 + $0x19c] sm:$0xf] }
 0x1ec   :  { %2330 = vmatmul.bf16.vlgmr.msrb.gmra.mxu2 %v5246_v25  ;;  %v3310_v8 = vor.u32 %v4007_v2, %v3309_v1  ;;  %v3143_v62 = vld [vmem:[%s6176_s7 + $0x1b4] sm:$0xf0]  ;;  %v3169_v1 = vld [vmem:[%s6176_s7 + $0x1d0] sm:$0xf]  ;;  %v3506_v2 = vor.u32 %v4056_v58, %v3505_v57  ;;  %v3394_v57 = vor.u32 %v4028_v46, %v3393_v45  ;;  %v4046_v45 = vld [vmem:[%s6176_s7 + $0x43c] sm:$0xf] }
 0x1ed   :  { %v3479_v46 = vld [vmem:[%s6176_s7 + $0x454] sm:$0xf0] }
 0x1ee   :  { %2341 = vmatpush.bf16.msrb.mxu3 %v2970_v10  ;;  %2353 = vmatpush.bf16.msra.mxu0 %v3222_v11  ;;  %v4087_v10 = vld [vmem:[%s6176_s7 + $0x584] sm:$0xf]  ;;  %v3639_v11 = vld [vmem:[%s6176_s7 + $0x59c] sm:$0xf0] }
 0x1ef   :  { %2363 = vmatpush.bf16.msra.mxu1 %v3530_v14  ;;  %2375 = vmatpush.bf16.msra.mxu2 %v3782_v15  ;;  %v3281_v14 = vld [vmem:[%s6176_s7 + $0x2b0] sm:$0xf]  ;;  %v4000_v15 = vld [vmem:[%s6176_s7 + $0x2c8] sm:$0xf0]  ;;  %v3642_v19 = vor.u32 %v4087_v10, %v3639_v11  ;;  %v3955_v11 = vld [vmem:[%s6176_s7 + $0x164] sm:$0xf] }
 0x1f0   :  { %v3282_v22 = vor.u32 %v4000_v15, %v3281_v14  ;;  %v4112_v10 = vld [vmem:[%s6176_s7 + $0x648] sm:$0xf0]  ;;  %v3367_v14 = vld [vmem:[%s6176_s7 + $0x374] sm:$0xf0]  ;;  %v3118_v20 = vor.u32 %v3955_v11, %v3115_v12 }
 0x1f1   :  { %v3920_v12 = vld [vmem:[%s6176_s7 + $0x4c] sm:$0xf] }
 0x1f2   :  { %2342 = vmatpush.bf16.msrb.mxu3 %v2942_v24  ;;  %2354 = vmatpush.bf16.msra.mxu0 %v3194_v26  ;;  %v3001_v24 = vld [vmem:[%s6176_s7 + $0x80] sm:$0xf]  ;;  %v3930_v26 = vld [vmem:[%s6176_s7 + $0x98] sm:$0xf0] }
 0x1f3   :  { %2364 = vmatpush.bf16.msra.mxu1 %v3502_v29  ;;  %2376 = vmatpush.bf16.msra.mxu2 %v3754_v30  ;;  %v3253_v29 = vld [vmem:[%s6176_s7 + $0x278] sm:$0xf]  ;;  %v3993_v30 = vld [vmem:[%s6176_s7 + $0x290] sm:$0xf0]  ;;  %v3002_v36 = vor.u32 %v3930_v26, %v3001_v24  ;;  %v3948_v24 = vld [vmem:[%s6176_s7 + $0x12c] sm:$0xf] }
 0x1f4   :  { %v3254_v37 = vor.u32 %v3993_v30, %v3253_v29  ;;  %v3087_v26 = vld [vmem:[%s6176_s7 + $0x144] sm:$0xf0]  ;;  %v3339_v29 = vld [vmem:[%s6176_s7 + $0x33c] sm:$0xf0] }
 0x1f5   :  { %2343 = vmatmul.bf16.vlgmr.msrb.gmra.mxu3 %v5153_v28 }
 0x1f6   :  { %2387 = vmatpush.bf16.msra.mxu3 %v3142_v34  ;;  %2355 = vmatpush.bf16.msra.mxu0 %v3166_v42  ;;  %v4133_v34 = vld [vmem:[%s6176_s7 + $0x6f0] sm:$0xf0] }
 0x1f7   :  { %2365 = vmatpush.bf16.msra.mxu1 %v3474_v43  ;;  %2377 = vmatpush.bf16.msra.mxu2 %v3726_v44  ;;  %v3814_v42 = vor.u32 %v4133_v34, %v3813_v33  ;;  %v3225_v43 = vld [vmem:[%s6176_s7 + $0x240] sm:$0xf]  ;;  %v3986_v44 = vld [vmem:[%s6176_s7 + $0x258] sm:$0xf0]  ;;  %v4035_v33 = vld [vmem:[%s6176_s7 + $0x3e0] sm:$0xf0]  ;;  %v3090_v34 = vor.u32 %v3948_v24, %v3087_v26 }
 0x1f8   :  { %v3226_v50 = vor.u32 %v3986_v44, %v3225_v43  ;;  %v3422_v43 = vor.u32 %v4035_v33, %v3421_v32  ;;  %v3913_v24 = vld [vmem:[%s6176_s7 + $0x14] sm:$0xf]  ;;  %v2947_v26 = vld [vmem:[%s6176_s7 + $0x2c] sm:$0xf0] }
 0x1f9   :  { %2356 = vmatmul.bf16.vlgmr.msra.gmra.mxu0 %v5168_v40  ;;  %v4053_v32 = vld [vmem:[%s6176_s7 + $0x474] sm:$0xf]  ;;  %v3507_v33 = vld [vmem:[%s6176_s7 + $0x48c] sm:$0xf0] }
 0x1fa   :  { %2388 = vmatpush.bf16.msra.mxu3 %v3114_v47  ;;  %2400 = vmatpush.bf16.msrb.mxu0 %v3366_v48  ;;  %v3785_v47 = vld [vmem:[%s6176_s7 + $0x6a0] sm:$0xf]  ;;  %v4126_v48 = vld [vmem:[%s6176_s7 + $0x6b8] sm:$0xf0] }
 0x1fb   :  { %2366 = vmatpush.bf16.msra.mxu1 %v3446_v55  ;;  %2378 = vmatpush.bf16.msra.mxu2 %v3698_v56  ;;  %v3786_v54 = vor.u32 %v4126_v48, %v3785_v47  ;;  %v3197_v55 = vld [vmem:[%s6176_s7 + $0x208] sm:$0xf]  ;;  %v3979_v56 = vld [vmem:[%s6176_s7 + $0x220] sm:$0xf0]  ;;  %v3062_v47 = vor.u32 %v3941_v38, %v3059_v39  ;;  %v2950_v38 = vor.u32 %v3913_v24, %v2947_v26  ;;  %v3037_v26 = vld [vmem:[%s6176_s7 + $0xc0] sm:$0xf] }
 0x1fc   :  { %v3198_v0 = vor.u32 %v3979_v56, %v3197_v55  ;;  %v4074_v55 = vld [vmem:[%s6176_s7 + $0x51c] sm:$0xf]  ;;  %v3591_v56 = vld [vmem:[%s6176_s7 + $0x534] sm:$0xf0]  ;;  %v3647_v24 = vld [vmem:[%s6176_s7 + $0x5a4] sm:$0xf0] }
 0x1fe   :  { %2389 = vmatpush.bf16.msra.mxu3 %v3086_v59  ;;  %2401 = vmatpush.bf16.msrb.mxu0 %v3338_v60  ;;  %v3757_v59 = vld [vmem:[%s6176_s7 + $0x668] sm:$0xf]  ;;  %v4119_v60 = vld [vmem:[%s6176_s7 + $0x680] sm:$0xf0] }
 0x1ff   :  { %2367 = vmatpush.bf16.msra.mxu1 %v3418_v3  ;;  %2379 = vmatpush.bf16.msra.mxu2 %v3670_v4  ;;  %v3758_v3 = vor.u32 %v4119_v60, %v3757_v59  ;;  %v3972_v4 = vld [vmem:[%s6176_s7 + $0x1e8] sm:$0xf0]  ;;  %v3617_v59 = vld [vmem:[%s6176_s7 + $0x550] sm:$0xf]  ;;  %v3034_v60 = vor.u32 %v3934_v51, %v3031_v52  ;;  %v3959_v51 = vld [vmem:[%s6176_s7 + $0x180] sm:$0xf0] }
 0x200   :  { %v3170_v15 = vor.u32 %v3972_v4, %v3169_v1  ;;  %v3594_v1 = vor.u32 %v4074_v55, %v3591_v56  ;;  %v4067_v4 = vld [vmem:[%s6176_s7 + $0x4e4] sm:$0xf]  ;;  %v3373_v52 = vld [vmem:[%s6176_s7 + $0x360] sm:$0xf]  ;;  %v3482_v55 = vor.u32 %v4046_v45, %v3479_v46  ;;  %v3994_v45 = vld [vmem:[%s6176_s7 + $0x298] sm:$0xf0] }
 0x201   :  { %v3569_v46 = vld [vmem:[%s6176_s7 + $0x4e8] sm:$0xf] }
 0x202   :  { %2390 = vmatpush.bf16.msra.mxu3 %v3058_v7  ;;  %2402 = vmatpush.bf16.msrb.mxu0 %v3310_v8  ;;  %v3146_v7 = vor.u32 %v3962_v61, %v3143_v62  ;;  %v3729_v8 = vld [vmem:[%s6176_s7 + $0x630] sm:$0xf]  ;;  %v4084_v62 = vld [vmem:[%s6176_s7 + $0x568] sm:$0xf0] }
 0x203   :  { %2368 = vmatpush.bf16.msra.mxu1 %v3390_v18  ;;  %2380 = vmatpush.bf16.msra.mxu2 %v3642_v19  ;;  %v3730_v17 = vor.u32 %v4112_v10, %v3729_v8  ;;  %v3449_v18 = vld [vmem:[%s6176_s7 + $0x400] sm:$0xf]  ;;  %v4042_v19 = vld [vmem:[%s6176_s7 + $0x418] sm:$0xf0]  ;;  %v3618_v8 = vor.u32 %v4084_v62, %v3617_v59  ;;  %v3703_v62 = vld [vmem:[%s6176_s7 + $0x614] sm:$0xf0] }
 0x204   :  { %v3450_v30 = vor.u32 %v4042_v19, %v3449_v18  ;;  %v4060_v18 = vld [vmem:[%s6176_s7 + $0x4ac] sm:$0xf]  ;;  %v3535_v19 = vld [vmem:[%s6176_s7 + $0x4c4] sm:$0xf0] }
 0x206   :  { %2391 = vmatpush.bf16.msra.mxu3 %v3030_v21  ;;  %2403 = vmatpush.bf16.msrb.mxu0 %v3282_v22  ;;  %v3370_v21 = vor.u32 %v4018_v13, %v3367_v14  ;;  %v3701_v22 = vld [vmem:[%s6176_s7 + $0x5f8] sm:$0xf]  ;;  %v2975_v13 = vld [vmem:[%s6176_s7 + $0x64] sm:$0xf0]  ;;  %v3566_v14 = vor.u32 %v4067_v4, %v3563_v5  ;;  %v4032_v5 = vld [vmem:[%s6176_s7 + $0x3cc] sm:$0xf] }
 0x207   :  { %2413 = vmatpush.bf16.msrb.mxu1 %v3590_v27  ;;  %2381 = vmatpush.bf16.msra.mxu2 %v3614_v35  ;;  %v4011_v27 = vld [vmem:[%s6176_s7 + $0x324] sm:$0xf]  ;;  %v3702_v31 = vor.u32 %v4105_v23, %v3701_v22  ;;  %v2978_v22 = vor.u32 %v3920_v12, %v2975_v13  ;;  %v3065_v12 = vld [vmem:[%s6176_s7 + $0xf8] sm:$0xf]  ;;  %v3945_v13 = vld [vmem:[%s6176_s7 + $0x110] sm:$0xf0] }
 0x208   :  { %2369 = vmatmul.bf16.vlgmr.msra.gmra.mxu1 %v5218_v9  ;;  %v3342_v35 = vor.u32 %v4011_v27, %v3339_v29  ;;  %v3538_v27 = vor.u32 %v4060_v18, %v3535_v19  ;;  %v4025_v18 = vld [vmem:[%s6176_s7 + $0x394] sm:$0xf]  ;;  %v3395_v19 = vld [vmem:[%s6176_s7 + $0x3ac] sm:$0xf0] }
 0x20a   :  { %2392 = vmatpush.bf16.msra.mxu3 %v3002_v36  ;;  %2404 = vmatpush.bf16.msrb.mxu0 %v3254_v37  ;;  %v3673_v36 = vld [vmem:[%s6176_s7 + $0x5c0] sm:$0xf]  ;;  %v4098_v37 = vld [vmem:[%s6176_s7 + $0x5d8] sm:$0xf0] }
 0x20b   :  { %2414 = vmatpush.bf16.msrb.mxu1 %v3562_v41  ;;  %2426 = vmatpush.bf16.msrb.mxu2 %v3814_v42  ;;  %v4004_v41 = vld [vmem:[%s6176_s7 + $0x2ec] sm:$0xf]  ;;  %v3311_v42 = vld [vmem:[%s6176_s7 + $0x304] sm:$0xf0]  ;;  %v3674_v44 = vor.u32 %v4098_v37, %v3673_v36  ;;  %v3149_v36 = vld [vmem:[%s6176_s7 + $0x1a0] sm:$0xf] }
 0x20c   :  { %2382 = vmatmul.bf16.vlgmr.msra.gmra.mxu2 %v5246_v25  ;;  %v3314_v48 = vor.u32 %v4004_v41, %v3311_v42  ;;  %v3966_v37 = vld [vmem:[%s6176_s7 + $0x1b8] sm:$0xf0]  ;;  %v3969_v41 = vld [vmem:[%s6176_s7 + $0x1d4] sm:$0xf]  ;;  %v3510_v42 = vor.u32 %v4053_v32, %v3507_v33  ;;  %v3597_v32 = vld [vmem:[%s6176_s7 + $0x520] sm:$0xf] }
 0x20d   :  { %v4078_v33 = vld [vmem:[%s6176_s7 + $0x538] sm:$0xf0] }
 0x20e   :  { %2393 = vmatpush.bf16.msra.mxu3 %v2974_v49  ;;  %2405 = vmatpush.bf16.msrb.mxu0 %v3226_v50  ;;  %v3645_v49 = vld [vmem:[%s6176_s7 + $0x588] sm:$0xf]  ;;  %v4091_v50 = vld [vmem:[%s6176_s7 + $0x5a0] sm:$0xf0] }
 0x20f   :  { %2415 = vmatpush.bf16.msrb.mxu1 %v3534_v53  ;;  %2427 = vmatpush.bf16.msrb.mxu2 %v3786_v54  ;;  %v3997_v53 = vld [vmem:[%s6176_s7 + $0x2b4] sm:$0xf]  ;;  %v3283_v54 = vld [vmem:[%s6176_s7 + $0x2cc] sm:$0xf0]  ;;  %v3646_v58 = vor.u32 %v4091_v50, %v3645_v49  ;;  %v3121_v50 = vld [vmem:[%s6176_s7 + $0x168] sm:$0xf] }
 0x210   :  { %v3286_v61 = vor.u32 %v3997_v53, %v3283_v54  ;;  %v3731_v49 = vld [vmem:[%s6176_s7 + $0x64c] sm:$0xf0]  ;;  %v4022_v53 = vld [vmem:[%s6176_s7 + $0x378] sm:$0xf0]  ;;  %v3122_v59 = vor.u32 %v3959_v51, %v3121_v50 }
 0x212   :  { %2394 = vmatpush.bf16.msra.mxu3 %v2946_v63  ;;  %2406 = vmatpush.bf16.msrb.mxu0 %v3198_v0  ;;  %v3927_v63 = vld [vmem:[%s6176_s7 + $0x84] sm:$0xf]  ;;  %v3003_v0 = vld [vmem:[%s6176_s7 + $0x9c] sm:$0xf0] }
 0x213   :  { %2416 = vmatpush.bf16.msrb.mxu1 %v3506_v2  ;;  %2428 = vmatpush.bf16.msrb.mxu2 %v3758_v3  ;;  %v3990_v2 = vld [vmem:[%s6176_s7 + $0x27c] sm:$0xf]  ;;  %v3255_v3 = vld [vmem:[%s6176_s7 + $0x294] sm:$0xf0]  ;;  %v3006_v10 = vor.u32 %v3927_v63, %v3003_v0  ;;  %v3093_v63 = vld [vmem:[%s6176_s7 + $0x130] sm:$0xf] }
 0x214   :  { %v3258_v11 = vor.u32 %v3990_v2, %v3255_v3  ;;  %v3952_v0 = vld [vmem:[%s6176_s7 + $0x148] sm:$0xf0]  ;;  %v4015_v2 = vld [vmem:[%s6176_s7 + $0x340] sm:$0xf0] }
 0x215   :  { %2395 = vmatmul.bf16.vlgmr.msra.gmra.mxu3 %v5153_v28 }
 0x216   :  { %2439 = vmatpush.bf16.msrb.mxu3 %v3146_v7  ;;  %2407 = vmatpush.bf16.msrb.mxu0 %v3170_v15  ;;  %v3815_v7 = vld [vmem:[%s6176_s7 + $0x6f4] sm:$0xf0] }
 0x217   :  { %2417 = vmatpush.bf16.msrb.mxu1 %v3478_v16  ;;  %2429 = vmatpush.bf16.msrb.mxu2 %v3730_v17  ;;  %v3818_v15 = vor.u32 %v4130_v6, %v3815_v7  ;;  %v3983_v16 = vld [vmem:[%s6176_s7 + $0x244] sm:$0xf]  ;;  %v3227_v17 = vld [vmem:[%s6176_s7 + $0x25c] sm:$0xf0]  ;;  %v3423_v6 = vld [vmem:[%s6176_s7 + $0x3e4] sm:$0xf0]  ;;  %v3094_v7 = vor.u32 %v3952_v0, %v3093_v63 }
 0x218   :  { %v3230_v23 = vor.u32 %v3983_v16, %v3227_v17  ;;  %v3426_v16 = vor.u32 %v4032_v5, %v3423_v6  ;;  %v3793_v63 = vld [vmem:[%s6176_s7 + $0x6a8] sm:$0xf]  ;;  %v4127_v0 = vld [vmem:[%s6176_s7 + $0x6c0] sm:$0xf0]  ;;  %v3917_v5 = vld [vmem:[%s6176_s7 + $0x30] sm:$0xf0] }
 0x219   :  { %2408 = vmatmul.bf16.vlgmr.msrb.gmra.mxu0 %v5168_v40 }
 0x21a   :  { %2440 = vmatpush.bf16.msrb.mxu3 %v3118_v20  ;;  %2452 = vmatpush.bf16.msra.mxu0 %v3370_v21  ;;  %v4123_v20 = vld [vmem:[%s6176_s7 + $0x6a4] sm:$0xf]  ;;  %v3787_v21 = vld [vmem:[%s6176_s7 + $0x6bc] sm:$0xf0] }
 0x21b   :  { %2418 = vmatpush.bf16.msrb.mxu1 %v3450_v30  ;;  %2430 = vmatpush.bf16.msrb.mxu2 %v3702_v31  ;;  %v3790_v29 = vor.u32 %v4123_v20, %v3787_v21  ;;  %v3976_v30 = vld [vmem:[%s6176_s7 + $0x20c] sm:$0xf]  ;;  %v3199_v31 = vld [vmem:[%s6176_s7 + $0x224] sm:$0xf0]  ;;  %v3066_v20 = vor.u32 %v3945_v13, %v3065_v12  ;;  %v4057_v12 = vld [vmem:[%s6176_s7 + $0x490] sm:$0xf0] }
 0x21c   :  { %v3202_v39 = vor.u32 %v3976_v30, %v3199_v31  ;;  %v4001_v30 = vld [vmem:[%s6176_s7 + $0x2d0] sm:$0xf0]  ;;  %v3765_v13 = vld [vmem:[%s6176_s7 + $0x670] sm:$0xf] }
 0x21e   :  { %2441 = vmatpush.bf16.msrb.mxu3 %v3090_v34  ;;  %2453 = vmatpush.bf16.msra.mxu0 %v3342_v35  ;;  %v4116_v34 = vld [vmem:[%s6176_s7 + $0x66c] sm:$0xf]  ;;  %v3759_v35 = vld [vmem:[%s6176_s7 + $0x684] sm:$0xf0] }
 0x21f   :  { %2419 = vmatpush.bf16.msrb.mxu1 %v3422_v43  ;;  %2431 = vmatpush.bf16.msrb.mxu2 %v3674_v44  ;;  %v3762_v43 = vor.u32 %v4116_v34, %v3759_v35  ;;  %v3171_v44 = vld [vmem:[%s6176_s7 + $0x1ec] sm:$0xf0]  ;;  %v3398_v34 = vor.u32 %v4025_v18, %v3395_v19 }
 0x220   :  { %v3174_v54 = vor.u32 %v3969_v41, %v3171_v44  ;;  %v3009_v41 = vld [vmem:[%s6176_s7 + $0x88] sm:$0xf]  ;;  %v3261_v44 = vld [vmem:[%s6176_s7 + $0x280] sm:$0xf] }
 0x222   :  { %2442 = vmatpush.bf16.msrb.mxu3 %v3062_v47  ;;  %2454 = vmatpush.bf16.msra.mxu0 %v3314_v48  ;;  %v3150_v47 = vor.u32 %v3966_v37, %v3149_v36  ;;  %v4109_v48 = vld [vmem:[%s6176_s7 + $0x634] sm:$0xf] }
 0x223   :  { %2420 = vmatpush.bf16.msrb.mxu1 %v3394_v57  ;;  %2432 = vmatpush.bf16.msrb.mxu2 %v3646_v58  ;;  %v3734_v56 = vor.u32 %v4109_v48, %v3731_v49  ;;  %v4039_v57 = vld [vmem:[%s6176_s7 + $0x404] sm:$0xf]  ;;  %v3451_v58 = vld [vmem:[%s6176_s7 + $0x41c] sm:$0xf0]  ;;  %v4081_v36 = vld [vmem:[%s6176_s7 + $0x554] sm:$0xf] }
 0x224   :  { %v3454_v3 = vor.u32 %v4039_v57, %v3451_v58  ;;  %v3821_v48 = vld [vmem:[%s6176_s7 + $0x6e0] sm:$0xf]  ;;  %v4134_v49 = vld [vmem:[%s6176_s7 + $0x6f8] sm:$0xf0]  ;;  %v3233_v58 = vld [vmem:[%s6176_s7 + $0x248] sm:$0xf] }
 0x225   :  { %v3822_v57 = vor.u32 %v4134_v49, %v3821_v48  ;;  %v4036_v48 = vld [vmem:[%s6176_s7 + $0x3e8] sm:$0xf0]  ;;  %v4099_v49 = vld [vmem:[%s6176_s7 + $0x5e0] sm:$0xf0] }
 0x226   :  { %2443 = vmatpush.bf16.msrb.mxu3 %v3034_v60  ;;  %2455 = vmatpush.bf16.msra.mxu0 %v3286_v61  ;;  %v3374_v60 = vor.u32 %v4022_v53, %v3373_v52  ;;  %v4102_v61 = vld [vmem:[%s6176_s7 + $0x5fc] sm:$0xf]  ;;  %v3262_v52 = vor.u32 %v3994_v45, %v3261_v44 }
 0x227   :  { %2465 = vmatpush.bf16.msra.mxu1 %v3594_v1  ;;  %2433 = vmatpush.bf16.msrb.mxu2 %v3618_v8  ;;  %v3345_v1 = vld [vmem:[%s6176_s7 + $0x328] sm:$0xf]  ;;  %v3706_v4 = vor.u32 %v4102_v61, %v3703_v62  ;;  %v4064_v62 = vld [vmem:[%s6176_s7 + $0x4c8] sm:$0xf0] }
 0x228   :  { %2421 = vmatmul.bf16.vlgmr.msrb.gmra.mxu1 %v5218_v9  ;;  %v3346_v8 = vor.u32 %v4015_v2, %v3345_v1 }
 0x22a   :  { %2444 = vmatpush.bf16.msrb.mxu3 %v3006_v10  ;;  %2456 = vmatpush.bf16.msra.mxu0 %v3258_v11  ;;  %v4095_v10 = vld [vmem:[%s6176_s7 + $0x5c4] sm:$0xf]  ;;  %v3675_v11 = vld [vmem:[%s6176_s7 + $0x5dc] sm:$0xf0] }
 0x22b   :  { %2466 = vmatpush.bf16.msra.mxu1 %v3566_v14  ;;  %2478 = vmatpush.bf16.msra.mxu2 %v3818_v15  ;;  %v3317_v14 = vld [vmem:[%s6176_s7 + $0x2f0] sm:$0xf]  ;;  %v4008_v15 = vld [vmem:[%s6176_s7 + $0x308] sm:$0xf0]  ;;  %v3678_v17 = vor.u32 %v4095_v10, %v3675_v11  ;;  %v3513_v11 = vld [vmem:[%s6176_s7 + $0x478] sm:$0xf] }
 0x22c   :  { %2434 = vmatmul.bf16.vlgmr.msrb.gmra.mxu2 %v5246_v25  ;;  %v3318_v21 = vor.u32 %v4008_v15, %v3317_v14  ;;  %v3980_v10 = vld [vmem:[%s6176_s7 + $0x228] sm:$0xf0]  ;;  %v3514_v18 = vor.u32 %v4057_v12, %v3513_v11 }
 0x22d   :  { %v4120_v14 = vld [vmem:[%s6176_s7 + $0x688] sm:$0xf0] }
 0x22e   :  { %2445 = vmatpush.bf16.msrb.mxu3 %v2978_v22  ;;  %2457 = vmatpush.bf16.msra.mxu0 %v3230_v23  ;;  %v4088_v23 = vld [vmem:[%s6176_s7 + $0x58c] sm:$0xf]  ;;  %v3766_v19 = vor.u32 %v4120_v14, %v3765_v13 }
 0x22f   :  { %2467 = vmatpush.bf16.msra.mxu1 %v3538_v27  ;;  %2479 = vmatpush.bf16.msra.mxu2 %v3790_v29  ;;  %v3938_v27 = vld [vmem:[%s6176_s7 + $0xd8] sm:$0xf0]  ;;  %v3289_v29 = vld [vmem:[%s6176_s7 + $0x2b8] sm:$0xf]  ;;  %v3650_v35 = vor.u32 %v4088_v23, %v3647_v24  ;;  %v3485_v23 = vld [vmem:[%s6176_s7 + $0x440] sm:$0xf] }
 0x230   :  { %v3038_v37 = vor.u32 %v3938_v27, %v3037_v26  ;;  %v4050_v26 = vld [vmem:[%s6176_s7 + $0x458] sm:$0xf0]  ;;  %v3737_v27 = vld [vmem:[%s6176_s7 + $0x638] sm:$0xf] }
 0x232   :  { %2446 = vmatpush.bf16.msrb.mxu3 %v2950_v38  ;;  %2458 = vmatpush.bf16.msra.mxu0 %v3202_v39  ;;  %v3290_v38 = vor.u32 %v4001_v30, %v3289_v29  ;;  %v3619_v39 = vld [vmem:[%s6176_s7 + $0x56c] sm:$0xf0]  ;;  %v4113_v29 = vld [vmem:[%s6176_s7 + $0x650] sm:$0xf0] }
 0x233   :  { %2468 = vmatpush.bf16.msra.mxu1 %v3510_v42  ;;  %2480 = vmatpush.bf16.msra.mxu2 %v3762_v43  ;;  %v3931_v42 = vld [vmem:[%s6176_s7 + $0xa0] sm:$0xf0]  ;;  %v3598_v43 = vor.u32 %v4078_v33, %v3597_v32  ;;  %v3622_v50 = vor.u32 %v4081_v36, %v3619_v39  ;;  %v3457_v36 = vld [vmem:[%s6176_s7 + $0x408] sm:$0xf]  ;;  %v3709_v39 = vld [vmem:[%s6176_s7 + $0x600] sm:$0xf] }
 0x234   :  { %v3010_v51 = vor.u32 %v3931_v42, %v3009_v41  ;;  %v6107_v33 = vld [vmem:[%s6177_s8] sm:$0x7f]  ;;  %v4106_v41 = vld [vmem:[%s6176_s7 + $0x618] sm:$0xf0] }
 0x235   :  { %2447 = vmatmul.bf16.vlgmr.msrb.gmra.mxu3 %v5153_v28  ;;  %v1013_v42 = vperm.slane %v6107_v33, 0  ;;  %v3710_v45 = vor.u32 %v4106_v41, %v3709_v39 }
 0x236   :  { %2491 = vmatpush.bf16.msra.mxu3 %v3150_v47  ;;  %2459 = vmatpush.bf16.msra.mxu0 %v3174_v54  ;;  %v5974_v22 = vpop.f32.mrf.mxu0  ;;  %v4071_v47 = vld [vmem:[%s6176_s7 + $0x500] sm:$0xf0]  ;;  %v2981_v54 = vld [vmem:[%s6176_s7 + $0x50] sm:$0xf] }
 0x237   :  { %2469 = vmatpush.bf16.msra.mxu1 %v3482_v55  ;;  %2481 = vmatpush.bf16.msra.mxu2 %v3734_v56  ;;  %v3924_v55 = vld [vmem:[%s6176_s7 + $0x68] sm:$0xf0]  ;;  %v3570_v56 = vor.u32 %v4071_v47, %v3569_v46  ;;  %v3429_v46 = vld [vmem:[%s6176_s7 + $0x3d0] sm:$0xf] }
 0x238   :  { %v5994_v31 = vpop.f32.mrf.mxu3  ;;  %v2982_v1 = vor.u32 %v3924_v55, %v2981_v54  ;;  %v3401_v55 = vld [vmem:[%s6176_s7 + $0x398] sm:$0xf] }
 0x239   :  { %2460 = vmatmul.bf16.vlgmr.msra.gmra.mxu0 %v5168_v40 }
 0x23a   :  { %2492 = vmatpush.bf16.msra.mxu3 %v3122_v59  ;;  %2504 = vmatpush.bf16.msrb.mxu0 %v3374_v60  ;;  %v3987_v59 = vld [vmem:[%s6176_s7 + $0x260] sm:$0xf0]  ;;  %v3541_v60 = vld [vmem:[%s6176_s7 + $0x4b0] sm:$0xf] }
 0x23b   :  { %2470 = vmatpush.bf16.msra.mxu1 %v3454_v3  ;;  %2482 = vmatpush.bf16.msra.mxu2 %v3706_v4  ;;  %v3234_v2 = vor.u32 %v3987_v59, %v3233_v58  ;;  %v2953_v4 = vld [vmem:[%s6176_s7 + $0x18] sm:$0xf]  ;;  %v3542_v6 = vor.u32 %v4064_v62, %v3541_v60 }
 0x23c   :  { %v2954_v15 = vor.u32 %v3917_v5, %v2953_v4 }
 0x23e   :  { %2493 = vmatpush.bf16.msra.mxu3 %v3094_v7  ;;  %2505 = vmatpush.bf16.msrb.mxu0 %v3346_v8  ;;  %v2203_v53 = vpop.f32.mrf.mxu0  ;;  %v3794_v7 = vor.u32 %v4127_v0, %v3793_v63  ;;  %v3205_v8 = vld [vmem:[%s6176_s7 + $0x210] sm:$0xf] }
 0x23f   :  { %2471 = vmatpush.bf16.msra.mxu1 %v3426_v16  ;;  %2483 = vmatpush.bf16.msra.mxu2 %v3678_v17  ;;  %v3206_v16 = vor.u32 %v3980_v10, %v3205_v8  ;;  %v3430_v53 = vor.u32 %v4036_v48, %v3429_v46 }
 0x240   :  { %v2190_v61 = vpop.f32.mrf.mxu3 }
 0x242   :  { %2494 = vmatpush.bf16.msra.mxu3 %v3066_v20  ;;  %2506 = vmatpush.bf16.msrb.mxu0 %v3318_v21  ;;  %v6057_v3 = vpop.f32.mrf.mxu1  ;;  %v3177_v20 = vld [vmem:[%s6176_s7 + $0x1d8] sm:$0xf]  ;;  %v3973_v21 = vld [vmem:[%s6176_s7 + $0x1f0] sm:$0xf0] }
 0x243   :  { %2472 = vmatpush.bf16.msra.mxu1 %v3398_v34  ;;  %2484 = vmatpush.bf16.msra.mxu2 %v3650_v35  ;;  %v3178_v30 = vor.u32 %v3973_v21, %v3177_v20  ;;  %v3486_v34 = vor.u32 %v4050_v26, %v3485_v23  ;;  %v3738_v35 = vor.u32 %v4113_v29, %v3737_v27  ;;  %v1016_v26 = vperm.slane %v6107_v33, 3 }
 0x246   :  { %2495 = vmatpush.bf16.msra.mxu3 %v3038_v37  ;;  %2507 = vmatpush.bf16.msrb.mxu0 %v3290_v38  ;;  %v6084_v17 = vpop.f32.mrf.mxu0  ;;  %v4043_v38 = vld [vmem:[%s6176_s7 + $0x420] sm:$0xf0] }
 0x247   :  { %2517 = vmatpush.bf16.msrb.mxu1 %v3598_v43  ;;  %2485 = vmatpush.bf16.msra.mxu2 %v3622_v50  ;;  %v3458_v44 = vor.u32 %v4043_v38, %v3457_v36  ;;  %v1014_v50 = vperm.slane %v6107_v33, 1 }
 0x248   :  { %2473 = vmatmul.bf16.vlgmr.msra.gmra.mxu1 %v5218_v9  ;;  %v2240_v24 = vpop.f32.mrf.mxu3 }
 0x249   :  { %v2241_v58 = vadd.f32 %v2240_v24, %v1014_v50 }
 0x24a   :  { %2496 = vmatpush.bf16.msra.mxu3 %v3010_v51  ;;  %2508 = vmatpush.bf16.msrb.mxu0 %v3262_v52  ;;  %v2216_v32 = vpop.f32.mrf.mxu1  ;;  %v2189_v51 = vadd.f32 %v5994_v31, %v1013_v42  ;;  %v4092_v31 = vld [vmem:[%s6176_s7 + $0x5a8] sm:$0xf0] }
 0x24b   :  { %2518 = vmatpush.bf16.msrb.mxu1 %v3570_v56  ;;  %2530 = vmatpush.bf16.msrb.mxu2 %v3822_v57  ;;  %v4029_v57 = vld [vmem:[%s6176_s7 + $0x3b0] sm:$0xf0]  ;;  %v2254_v4 = vadd.f32 %v6084_v17, %v2241_v58 }
 0x24c   :  { %2486 = vmatmul.bf16.vlgmr.msra.gmra.mxu2 %v5246_v25  ;;  %v2227_v37 = vpop.f32.mrf.mxu2  ;;  %v2202_v59 = vadd.f32 %v5974_v22, %v2189_v51  ;;  %v3402_v61 = vor.u32 %v4029_v57, %v3401_v55  ;;  %v1017_v55 = vperm.slane %v6107_v33, 4  ;;  %v1018_v57 = vperm.slane %v6107_v33, 5 }
 0x24e   :  { %2497 = vmatpush.bf16.msra.mxu3 %v2982_v1  ;;  %2509 = vmatpush.bf16.msrb.mxu0 %v3234_v2  ;;  %v2255_v43 = vpop.f32.mrf.mxu0  ;;  %v2215_v63 = vadd.f32 %v6057_v3, %v2202_v59  ;;  %v3625_v1 = vld [vmem:[%s6176_s7 + $0x558] sm:$0xf]  ;;  %v4085_v2 = vld [vmem:[%s6176_s7 + $0x570] sm:$0xf0] }
 0x24f   :  { %2519 = vmatpush.bf16.msrb.mxu1 %v3542_v6  ;;  %2531 = vmatpush.bf16.msrb.mxu2 %v3794_v7  ;;  %v3626_v7 = vor.u32 %v4085_v2, %v3625_v1 }
 0x250   :  { %v2242_v47 = vpop.f32.mrf.mxu3  ;;  %v2228_v5 = vadd.f32 %v2227_v37, %v2215_v63 }
 0x252   :  { %2498 = vmatpush.bf16.msra.mxu3 %v2954_v15  ;;  %2510 = vmatpush.bf16.msrb.mxu0 %v3206_v16  ;;  %v2266_v52 = vpop.f32.mrf.mxu1  ;;  %4137 = vtanh.f32 %v2228_v5 }
 0x253   :  { %2520 = vmatpush.bf16.msrb.mxu1 %v3514_v18  ;;  %2532 = vmatpush.bf16.msrb.mxu2 %v3766_v19  ;;  %v2267_v6 = vadd.f32 %v2266_v52, %v2254_v4 }
 0x254   :  { %v2229_v56 = vpop.f32.mrf.mxu2 }
 0x255   :  { %2499 = vmatmul.bf16.vlgmr.msra.gmra.mxu3 %v5153_v28  ;;  %v3681_v28 = vld [vmem:[%s6176_s7 + $0x5c8] sm:$0xf] }
 0x256   :  { %2511 = vmatpush.bf16.msrb.mxu0 %v3178_v30  ;;  %v3682_v54 = vor.u32 %v4099_v49, %v3681_v28  ;;  %v2305_v60 = vpop.f32.mrf.mxu0 }
 0x257   :  { %2521 = vmatpush.bf16.msrb.mxu1 %v3486_v34  ;;  %2533 = vmatpush.bf16.msrb.mxu2 %v3738_v35 }
 0x258   :  { %v2292_v0 = vpop.f32.mrf.mxu3  ;;  %v4138_v13 = vpop.eup %4137 }
 0x259   :  { %2512 = vmatmul.bf16.vlgmr.msrb.gmra.mxu0 %v5168_v40  ;;  %v3653_v40 = vld [vmem:[%s6176_s7 + $0x590] sm:$0xf]  ;;  %s4177_s7 = smov [#allocation2]  }
 0x25a   :  { %v3654_v62 = vor.u32 %v4092_v31, %v3653_v40  ;;  %v2268_v22 = vpop.f32.mrf.mxu1  ;;  %s2564_s25 = sshll.u32 %s4177_s7, 4  ;;  %s2565_s25 = int_to_ptr.vmem [resolvable:$true] %s2564_s25 }
 0x25b   :  { %2522 = vmatpush.bf16.msrb.mxu1 %v3458_v44  ;;  %2534 = vmatpush.bf16.msrb.mxu2 %v3710_v45 }
 0x25c   :  { %v2279_v8 = vpop.f32.mrf.mxu2 }
 0x25d   :  { %v2280_v10 = vadd.f32 %v2279_v8, %v2267_v6 }
 0x25e   :  { %v2307_v3 = vpop.f32.mrf.mxu0 }
 0x25f   :  { %2523 = vmatpush.bf16.msrb.mxu1 %v3430_v53  ;;  %2535 = vmatpush.bf16.msrb.mxu2 %v3682_v54  ;;  %4139 = vtanh.f32 %v2280_v10 }
 0x260   :  { %v2294_v11 = vpop.f32.mrf.mxu3 }
 0x261   :  { %v1019_v11 = vperm.slane %v6107_v33, 6 }
 0x263   :  { %2524 = vmatpush.bf16.msrb.mxu1 %v3402_v61  ;;  %2536 = vmatpush.bf16.msrb.mxu2 %v3654_v62 }
 0x264   :  { %v2281_v14 = vpop.f32.mrf.mxu2 }
 0x265   :  { %v2318_v12 = vpop.f32.mrf.mxu1  ;;  %v4140_v15 = vpop.eup %4139 }
 0x266   :  { %2525 = vmatmul.bf16.vlgmr.msrb.gmra.mxu1 %v5218_v9  ;;  %v2550_v16 = vpack.c.bf16 %v4140_v15, %v4138_v13  ;;  %v1015_v9 = vperm.slane %v6107_v33, 2 }
 0x267   :  { %2537 = vmatpush.bf16.msrb.mxu2 %v3626_v7 }
 0x268   :  { %2554 = vst [vmem:[#allocation2] sm:$0xff] %v2550_v16  ;;  %v2293_v27 = vadd.f32 %v2292_v0, %v1015_v9 }
 0x26a   :  { %2538 = vmatmul.bf16.vlgmr.msrb.gmra.mxu2 %v5246_v25  ;;  %v2306_v30 = vadd.f32 %v2305_v60, %v2293_v27 }
 0x26c   :  { %v2319_v32 = vadd.f32 %v2318_v12, %v2306_v30 }
 0x26d   :  { %v2320_v17 = vpop.f32.mrf.mxu1 }
 0x26f   :  { %v2331_v18 = vpop.f32.mrf.mxu2 }
 0x270   :  { %v2332_v35 = vadd.f32 %v2331_v18, %v2319_v32 }
 0x272   :  { %4141 = vtanh.f32 %v2332_v35 }
 0x276   :  { %v2357_v19 = vpop.f32.mrf.mxu0 }
 0x277   :  { %v2333_v20 = vpop.f32.mrf.mxu2 }
 0x278   :  { %v2344_v21 = vpop.f32.mrf.mxu3  ;;  %v4142_v42 = vpop.eup %4141 }
 0x279   :  { %v2345_v25 = vadd.f32 %v2344_v21, %v1016_v26 }
 0x27b   :  { %v2358_v34 = vadd.f32 %v2357_v19, %v2345_v25 }
 0x27e   :  { %v2359_v23 = vpop.f32.mrf.mxu0 }
 0x280   :  { %v2346_v24 = vpop.f32.mrf.mxu3 }
 0x285   :  { %v2370_v29 = vpop.f32.mrf.mxu1 }
 0x286   :  { %v2371_v37 = vadd.f32 %v2370_v29, %v2358_v34 }
 0x28d   :  { %v2372_v36 = vpop.f32.mrf.mxu1 }
 0x28f   :  { %v2383_v38 = vpop.f32.mrf.mxu2 }
 0x290   :  { %v2384_v39 = vadd.f32 %v2383_v38, %v2371_v37 }
 0x292   :  { %4143 = vtanh.f32 %v2384_v39 }
 0x296   :  { %v2409_v41 = vpop.f32.mrf.mxu0 }
 0x297   :  { %v2385_v43 = vpop.f32.mrf.mxu2 }
 0x298   :  { %v4144_v44 = vpop.eup %4143  ;;  %v2396_v45 = vpop.f32.mrf.mxu3 }
 0x299   :  { %v2551_v46 = vpack.c.bf16 %v4144_v44, %v4142_v42  ;;  %v2397_v40 = vadd.f32 %v2396_v45, %v1017_v55 }
 0x29b   :  { %2555 = vst [vmem:[#allocation2 + $0x8] sm:$0xff] %v2551_v46  ;;  %v2410_v59 = vadd.f32 %v2409_v41, %v2397_v40 }
 0x29e   :  { %v2411_v47 = vpop.f32.mrf.mxu0 }
 0x2a0   :  { %v2398_v48 = vpop.f32.mrf.mxu3 }
 0x2a5   :  { %v2422_v28 = vpop.f32.mrf.mxu1 }
 0x2a6   :  { %v2423_v60 = vadd.f32 %v2422_v28, %v2410_v59 }
 0x2ad   :  { %v2424_v49 = vpop.f32.mrf.mxu1 }
 0x2af   :  { %v2435_v50 = vpop.f32.mrf.mxu2 }
 0x2b0   :  { %v2436_v62 = vadd.f32 %v2435_v50, %v2423_v60 }
 0x2b2   :  { %4145 = vtanh.f32 %v2436_v62 }
 0x2b6   :  { %v2461_v51 = vpop.f32.mrf.mxu0 }
 0x2b7   :  { %v2437_v52 = vpop.f32.mrf.mxu2 }
 0x2b8   :  { %v2448_v53 = vpop.f32.mrf.mxu3  ;;  %v4146_v5 = vpop.eup %4145 }
 0x2b9   :  { %v2449_v58 = vadd.f32 %v2448_v53, %v1018_v57 }
 0x2bb   :  { %v2462_v61 = vadd.f32 %v2461_v51, %v2449_v58 }
 0x2be   :  { %v2463_v54 = vpop.f32.mrf.mxu0 }
 0x2c0   :  { %v2450_v56 = vpop.f32.mrf.mxu3 }
 0x2c5   :  { %v2474_v31 = vpop.f32.mrf.mxu1 }
 0x2c6   :  { %v2475_v0 = vadd.f32 %v2474_v31, %v2462_v61 }
 0x2cd   :  { %v2476_v63 = vpop.f32.mrf.mxu1 }
 0x2cf   :  { %v2487_v1 = vpop.f32.mrf.mxu2 }
 0x2d0   :  { %v2488_v2 = vadd.f32 %v2487_v1, %v2475_v0 }
 0x2d2   :  { %4147 = vtanh.f32 %v2488_v2 }
 0x2d6   :  { %v2513_v4 = vpop.f32.mrf.mxu0 }
 0x2d7   :  { %v2489_v22 = vpop.f32.mrf.mxu2 }
 0x2d8   :  { %v4148_v6 = vpop.eup %4147  ;;  %v2500_v7 = vpop.f32.mrf.mxu3 }
 0x2d9   :  { %v2552_v8 = vpack.c.bf16 %v4148_v6, %v4146_v5  ;;  %v2501_v13 = vadd.f32 %v2500_v7, %v1019_v11 }
 0x2db   :  { %2556 = vst [vmem:[#allocation2 + $0x10] sm:$0xff] %v2552_v8  ;;  %v2514_v14 = vadd.f32 %v2513_v4, %v2501_v13 }
 0x2de   :  { %v2515_v10 = vpop.f32.mrf.mxu0 }
 0x2e0   :  { %v2502_v3 = vpop.f32.mrf.mxu3 }
 0x2e3   :  { %v2526_v12 = vpop.f32.mrf.mxu1 }
 0x2e4   :  { %v2527_v16 = vadd.f32 %v2526_v12, %v2514_v14 }
 0x2eb   :  { %v2528_v15 = vpop.f32.mrf.mxu1 }
 0x2ed   :  { %v2539_v17 = vpop.f32.mrf.mxu2 }
 0x2ee   :  { %v2540_v18 = vadd.f32 %v2539_v17, %v2527_v16 }
 0x2f0   :  { %4149 = vtanh.f32 %v2540_v18 }
 0x2f5   :  { %v2541_v19 = vpop.f32.mrf.mxu2 }
 0x2f6   :  { %v4150_v20 = vpop.eup %4149 }
 0x2f7   :  { %v2553_v21 = vpack.c.bf16 %v4150_v20, %v4150_v20 }
 0x2f9   :  { %2558 = vst.msk [vmem:[#allocation2 + $0x18] sm:$0xf] %vm2557_vm0, %v2553_v21 }
 0x2fa   :  { %2569 = dma.vmem_to_hbm [thread:$0]  %s2565_s25, 448, %s2567_s28, [#allocation3]  }
 0x2fb   :  { %4175 = dma.done.wait [#allocation3], 448  }
 0x2fc   :  { %4176 = vsyncadd [#allocation3], 4294966848 }
 0x2fd   :  { %2574 = vsyncpa [#allocation3], 1 }

</bundles_post_ra>
